<compile_context>
chip_gen: v7x
topology: tpu7x:2x2x1
jax: 0.10.0
libtpu: 0.0.40
codegen_flags: <defaults>
</compile_context>

<pallas_src>
import math
import numpy as np
import jax
import jax.numpy as jnp
from jax.experimental import pallas as pl
from jax.experimental.pallas import tpu as pltpu

_VMEM_LIMIT = 32 * 1024 * 1024  # raise v5e's 16 MiB scoped default; matches v6e/v7x defaults


# ----------------------------- tiling helpers -------------------------------------

def _q_tile(T, max_tile=256):
    """Largest query-tile that divides T, is a multiple of 8, and is <= max_tile."""
    if T <= max_tile:
        return T
    for cand in range(max_tile, 7, -8):
        if T % cand == 0:
            return cand
    return T


def _row_tile(R, target=512):
    """Fixed row tile (multiple of 8); Pallas pads/masks the ragged last block."""
    return R if R <= target else target


# ----------------------------- Pallas kernels ------------------------------------

def _attn_sublayer_kernel_factory(num_heads, eps, tq):
    """x + MHA(LayerNorm(x)) — QKV cached in VMEM scratch, grid over (batch, q-tiles)."""
    def kernel(x_ref, bias_ref, g_ref, b_ref, wqkv_ref, bqkv_ref, wo_ref, bo_ref,
               o_ref, qkv_scr, attn_scr):
        qi = pl.program_id(1)
        T, D = x_ref.shape
        dk = D // num_heads
        scale = 1.0 / math.sqrt(dk)

        # --- once per batch element: LayerNorm(x) + fused QKV projection -> scratch ---
        @pl.when(qi == 0)
        def _():
            xf = x_ref[...].astype(jnp.float32)                       # (T, D)
            mean = jnp.mean(xf, axis=-1, keepdims=True)
            diff = xf - mean
            var = jnp.sum(diff * diff, axis=-1, keepdims=True) / (D - 1)   # torch.std unbiased
            xn = g_ref[...] * diff / (jnp.sqrt(var) + eps) + b_ref[...]
            qkv = jnp.dot(xn.astype(jnp.bfloat16), wqkv_ref[...],
                          preferred_element_type=jnp.float32) + bqkv_ref[...]
            qkv_scr[...] = qkv.astype(jnp.bfloat16)                   # (T, 3D) QKV cache

        # --- per query tile ---
        row0 = pl.multiple_of(qi * tq, tq)
        # fold 1/sqrt(dk) into the query tile once (tq*dk mul instead of per-head tq*T)
        q = (qkv_scr[pl.ds(row0, tq), :D].astype(jnp.float32) * scale).astype(jnp.bfloat16)
        bias = bias_ref[...].astype(jnp.float32)                      # (tq, T) additive mask

        for h in range(num_heads):                                    # static unroll
            qh = q[:, h * dk:(h + 1) * dk]
            kh = qkv_scr[:, D + h * dk: D + (h + 1) * dk]             # (T, dk) bf16
            vh = qkv_scr[:, 2 * D + h * dk: 2 * D + (h + 1) * dk]
            s = jax.lax.dot_general(                                   # (tq, T) f32
                qh, kh, (((1,), (1,)), ((), ())),
                preferred_element_type=jnp.float32) + bias
            s = s - jnp.max(s, axis=-1, keepdims=True)
            p = jnp.exp(s)
            p = p * pl.reciprocal(jnp.sum(p, axis=-1, keepdims=True), approx=True)
            # per-head result straight to VMEM scratch lane slice (no concat, short live range)
            attn_scr[:, h * dk:(h + 1) * dk] = jnp.dot(
                p.astype(jnp.bfloat16), vh, preferred_element_type=jnp.float32)

        out = jnp.dot(attn_scr[...].astype(jnp.bfloat16), wo_ref[...],
                      preferred_element_type=jnp.float32) + bo_ref[...]
        xq = x_ref[pl.ds(row0, tq), :].astype(jnp.float32)
        o_ref[...] = (xq + out).astype(o_ref.dtype)                   # residual
    return kernel


def _ffn_sublayer_kernel_factory(eps):
    """x + W2(relu(W1(LayerNorm(x)))) on a tile of rows."""
    def kernel(x_ref, g_ref, bta_ref, w1_ref, b1_ref, w2_ref, b2_ref, o_ref):
        x = x_ref[...].astype(jnp.float32)                            # (tile_r, D)
        D = x.shape[-1]
        mean = jnp.mean(x, axis=-1, keepdims=True)
        diff = x - mean
        var = jnp.sum(diff * diff, axis=-1, keepdims=True) / (D - 1)
        xn = g_ref[...] * diff / (jnp.sqrt(var) + eps) + bta_ref[...]

        h = jnp.dot(xn.astype(jnp.bfloat16), w1_ref[...],
                    preferred_element_type=jnp.float32) + b1_ref[...]
        h = jnp.maximum(h, 0.0)                                       # relu (f32)
        y = jnp.dot(h.astype(jnp.bfloat16), w2_ref[...],
                    preferred_element_type=jnp.float32) + b2_ref[...]
        o_ref[...] = (x + y).astype(o_ref.dtype)                      # residual
    return kernel


def _layernorm_kernel_factory(eps):
    def kernel(x_ref, g_ref, b_ref, o_ref):
        x = x_ref[...].astype(jnp.float32)
        D = x.shape[-1]
        mean = jnp.mean(x, axis=-1, keepdims=True)
        diff = x - mean
        var = jnp.sum(diff * diff, axis=-1, keepdims=True) / (D - 1)
        o_ref[...] = (g_ref[...] * diff / (jnp.sqrt(var) + eps) + b_ref[...]).astype(o_ref.dtype)
    return kernel


# ----------------------------- pallas_call wrappers -------------------------------

def attn_sublayer(x, bias, ln_g, ln_b, wqkv, bqkv, wo, bo, num_heads, eps=1e-6):
    B, T, D = x.shape
    tq = _q_tile(T)
    nq = T // tq
    return pl.pallas_call(
        _attn_sublayer_kernel_factory(num_heads, eps, tq),
        out_shape=jax.ShapeDtypeStruct((B, T, D), x.dtype),
        grid=(B, nq),
        in_specs=[
            pl.BlockSpec((None, T, D), lambda b, q: (b, 0, 0)),       # x (resident across q tiles)
            pl.BlockSpec((None, tq, T), lambda b, q: (b, q, 0)),      # additive mask bias (bf16)
            pl.BlockSpec((1, D), lambda b, q: (0, 0)),                # ln gamma
            pl.BlockSpec((1, D), lambda b, q: (0, 0)),                # ln beta
            pl.BlockSpec((D, 3 * D), lambda b, q: (0, 0)),            # fused W_qkv (bf16)
            pl.BlockSpec((1, 3 * D), lambda b, q: (0, 0)),            # fused b_qkv
            pl.BlockSpec((D, D), lambda b, q: (0, 0)),                # W_o (bf16)
            pl.BlockSpec((1, D), lambda b, q: (0, 0)),                # b_o
        ],
        out_specs=pl.BlockSpec((None, tq, D), lambda b, q: (b, q, 0)),
        scratch_shapes=[pltpu.VMEM((T, 3 * D), jnp.bfloat16),         # per-batch QKV cache
                        pltpu.VMEM((tq, D), jnp.float32)],            # per-tile head accumulator
        compiler_params=pltpu.CompilerParams(
            dimension_semantics=("parallel", "arbitrary"),
            vmem_limit_bytes=_VMEM_LIMIT),
    )(x, bias, ln_g.reshape(1, D), ln_b.reshape(1, D),
      wqkv, bqkv.reshape(1, 3 * D), wo, bo.reshape(1, D))


def ffn_sublayer(x, ln_g, ln_b, w1, b1, w2, b2, eps=1e-6):
    B, T, D = x.shape
    Dff = w1.shape[1]
    R = B * T
    tile_r = _row_tile(R)
    out = pl.pallas_call(
        _ffn_sublayer_kernel_factory(eps),
        out_shape=jax.ShapeDtypeStruct((R, D), x.dtype),
        grid=(pl.cdiv(R, tile_r),),
        in_specs=[
            pl.BlockSpec((tile_r, D), lambda i: (i, 0)),
            pl.BlockSpec((1, D), lambda i: (0, 0)),
            pl.BlockSpec((1, D), lambda i: (0, 0)),
            pl.BlockSpec((D, Dff), lambda i: (0, 0)),
            pl.BlockSpec((1, Dff), lambda i: (0, 0)),
            pl.BlockSpec((Dff, D), lambda i: (0, 0)),
            pl.BlockSpec((1, D), lambda i: (0, 0)),
        ],
        out_specs=pl.BlockSpec((tile_r, D), lambda i: (i, 0)),
        compiler_params=pltpu.CompilerParams(
            dimension_semantics=("parallel",),
            vmem_limit_bytes=_VMEM_LIMIT),
    )(x.reshape(R, D), ln_g.reshape(1, D), ln_b.reshape(1, D),
      w1, b1.reshape(1, Dff), w2, b2.reshape(1, D))
    return out.reshape(B, T, D)


def final_layernorm(x, g, b, eps=1e-6):
    B, T, D = x.shape
    R = B * T
    tile_r = _row_tile(R)
    out = pl.pallas_call(
        _layernorm_kernel_factory(eps),
        out_shape=jax.ShapeDtypeStruct((R, D), jnp.float32),
        grid=(pl.cdiv(R, tile_r),),
        in_specs=[pl.BlockSpec((tile_r, D), lambda i: (i, 0)),
                  pl.BlockSpec((1, D), lambda i: (0, 0)),
                  pl.BlockSpec((1, D), lambda i: (0, 0))],
        out_specs=pl.BlockSpec((tile_r, D), lambda i: (i, 0)),
        compiler_params=pltpu.CompilerParams(
            dimension_semantics=("parallel",),
            vmem_limit_bytes=_VMEM_LIMIT),
    )(x.reshape(R, D), g.reshape(1, D), b.reshape(1, D))
    return out.reshape(B, T, D)


# ----------------------------- Model glue (plain JAX) -----------------------------

def gpt_encoder_forward(src, src_mask, params, num_heads):
    d_model = params["embed"].shape[1]
    # src_embed = Embeddings(src) * sqrt(d_model) + PositionalEncoding
    # TODO(synk): embedding gather done with jnp.take (no clean single-kernel Pallas gather
    #             at these sizes); PE-dropout omitted (eval mode).
    x = jnp.take(params["embed"], src, axis=0) * math.sqrt(d_model)
    x = x + params["pe"][: src.shape[1]][None, :, :]
    x = x.astype(jnp.bfloat16)                      # bf16 residual stream between kernels

    # additive attention bias (torch masked_fill(mask==0, -1e9)), once for all layers, bf16
    bias = jnp.where(src_mask == 0, jnp.float32(-1e9), jnp.float32(0.0)).astype(jnp.bfloat16)

    def layer_step(h, lp):
        h = attn_sublayer(h, bias, lp["ln0_g"], lp["ln0_b"],
                          lp["wqkv"], lp["bqkv"], lp["wo"], lp["bo"], num_heads)
        h = ffn_sublayer(h, lp["ln1_g"], lp["ln1_b"],
                         lp["w1"], lp["b1"], lp["w2"], lp["b2"])
        return h, None

    x, _ = jax.lax.scan(layer_step, x, params["layers"])
    return final_layernorm(x, params["final_g"], params["final_b"])   # f32 output


# ----------------------------- Deterministic parameter init -----------------------

def _init_linear(key, din, dout, scale=0.05):
    kw, kb = jax.random.split(key)
    w = (jax.random.normal(kw, (din, dout), jnp.float32) * scale).astype(jnp.bfloat16)
    b = jax.random.normal(kb, (dout,), jnp.float32) * scale
    return w, b


def _init_layer(key, d_model, d_ff):
    ks = jax.random.split(key, 6)
    wq, bq = _init_linear(ks[0], d_model, d_model)
    wk, bk = _init_linear(ks[1], d_model, d_model)
    wv, bv = _init_linear(ks[2], d_model, d_model)
    wo, bo = _init_linear(ks[3], d_model, d_model)
    w1, b1 = _init_linear(ks[4], d_model, d_ff)
    w2, b2 = _init_linear(ks[5], d_ff, d_model)
    return {
        "ln0_g": jnp.ones((d_model,), jnp.float32),
        "ln0_b": jnp.zeros((d_model,), jnp.float32),
        "wqkv": jnp.concatenate([wq, wk, wv], axis=1),   # (D, 3D) bf16, fused QKV
        "bqkv": jnp.concatenate([bq, bk, bv], axis=0),   # (3D,)   f32
        "wo": wo, "bo": bo,
        "ln1_g": jnp.ones((d_model,), jnp.float32),
        "ln1_b": jnp.zeros((d_model,), jnp.float32),
        "w1": w1, "b1": b1, "w2": w2, "b2": b2,
    }


def _sinusoidal_pe(max_len, d_model):
    pos = np.arange(max_len, dtype=np.float32)[:, None]
    div = np.exp(np.arange(0, d_model, 2, dtype=np.float32) * (-math.log(10000.0) / d_model))
    pe = np.zeros((max_len, d_model), dtype=np.float32)
    pe[:, 0::2] = np.sin(pos * div)
    pe[:, 1::2] = np.cos(pos * div)
    return jnp.asarray(pe)


def init_params(key, n_layers, vocab, d_model, d_ff, max_len=512):
    k_emb, k_layers = jax.random.split(key)
    layer_keys = jax.random.split(k_layers, n_layers)
    per_layer = [_init_layer(k, d_model, d_ff) for k in layer_keys]
    layers = jax.tree_util.tree_map(lambda *xs: jnp.stack(xs, axis=0), *per_layer)
    return {
        "embed": jax.random.normal(k_emb, (vocab, d_model), jnp.float32) * 0.05,
        "pe": _sinusoidal_pe(max_len, d_model),
        "layers": layers,
        "final_g": jnp.ones((d_model,), jnp.float32),
        "final_b": jnp.zeros((d_model,), jnp.float32),
    }


# ----------------------------------- Main ------------------------------------------

if __name__ == "__main__":
    B, T, D, H, DFF, N_LAYERS, VOCAB = 2, 8, 32, 4, 64, 2, 50

    key = jax.random.PRNGKey(0)
    k_src, k_params = jax.random.split(key)

    src = jax.random.randint(k_src, (B, T), 0, VOCAB)                       # token ids
    # GPT-style causal mask: 1.0 = keep, 0.0 = masked (torch masked_fill(mask == 0, -1e9))
    src_mask = jnp.tile(jnp.tril(jnp.ones((T, T), jnp.float32))[None], (B, 1, 1))

    params = init_params(k_params, N_LAYERS, VOCAB, D, DFF)

    fwd = jax.jit(lambda s, m, p: gpt_encoder_forward(s, m, p, H))
    out = fwd(src, src_mask, params)
    out = jax.block_until_ready(out)

    assert out.shape == (B, T, D) and out.dtype == jnp.float32
    assert bool(jnp.all(jnp.isfinite(out)))
    print("KERNEL_OK")
</pallas_src>

<mosaic_0001>
module attributes {stable_mosaic.version = 11 : i64} {
  func.func @kernel(%arg0: i32, %arg1: i32, %arg2: memref<1x8x32xbf16, #tpu.memory_space<vmem>>, %arg3: memref<1x8x8xbf16, #tpu.memory_space<vmem>>, %arg4: memref<1x32xf32, #tpu.memory_space<vmem>>, %arg5: memref<1x32xf32, #tpu.memory_space<vmem>>, %arg6: memref<32x96xbf16, #tpu.memory_space<vmem>>, %arg7: memref<1x96xf32, #tpu.memory_space<vmem>>, %arg8: memref<32x32xbf16, #tpu.memory_space<vmem>>, %arg9: memref<1x32xf32, #tpu.memory_space<vmem>>, %arg10: memref<1x8x32xbf16, #tpu.memory_space<vmem>>, %arg11: memref<8x96xbf16, #tpu.memory_space<vmem>>, %arg12: memref<8x32xf32, #tpu.memory_space<vmem>>) attributes {dimension_semantics = [#tpu.dimension_semantics<parallel>, #tpu.dimension_semantics<arbitrary>], iteration_bounds = array<i64: 2, 1>, scalar_prefetch = 0 : i64, scratch_operands = 2 : i64, tpu.core_type = #tpu.core_type<tc>, window_params = [{transform_indices = @transform_0, window_bounds = array<i64: 1, 8, 32>}, {transform_indices = @transform_1, window_bounds = array<i64: 1, 8, 8>}, {pipeline_mode = #tpu.pipeline_mode<synchronous>, transform_indices = @transform_2, window_bounds = array<i64: 1, 32>}, {pipeline_mode = #tpu.pipeline_mode<synchronous>, transform_indices = @transform_3, window_bounds = array<i64: 1, 32>}, {pipeline_mode = #tpu.pipeline_mode<synchronous>, transform_indices = @transform_4, window_bounds = array<i64: 32, 96>}, {pipeline_mode = #tpu.pipeline_mode<synchronous>, transform_indices = @transform_5, window_bounds = array<i64: 1, 96>}, {pipeline_mode = #tpu.pipeline_mode<synchronous>, transform_indices = @transform_6, window_bounds = array<i64: 32, 32>}, {pipeline_mode = #tpu.pipeline_mode<synchronous>, transform_indices = @transform_7, window_bounds = array<i64: 1, 32>}, {transform_indices = @transform_8, window_bounds = array<i64: 1, 8, 32>}]} {
    %c0_i32 = arith.constant 0 : i32
    %0 = arith.cmpi eq, %arg1, %c0_i32 : i32
    %1 = arith.extui %0 : i1 to i32
    %c0_i32_0 = arith.constant 0 : i32
    %2 = arith.cmpi ne, %1, %c0_i32_0 : i32
    scf.if %2 {
      %c0_45 = arith.constant 0 : index
      %c0_46 = arith.constant 0 : index
      %c0_47 = arith.constant 0 : index
      %102 = vector.load %arg2[%c0_45, %c0_46, %c0_47] : memref<1x8x32xbf16, #tpu.memory_space<vmem>>, vector<1x8x32xbf16>
      %103 = vector.shape_cast %102 : vector<1x8x32xbf16> to vector<8x32xbf16>
      %104 = arith.extf %103 : vector<8x32xbf16> to vector<8x32xf32>
      %cst_48 = arith.constant dense<0.000000e+00> : vector<8xf32>
      %105 = vector.multi_reduction <add>, %104, %cst_48 [1] : vector<8x32xf32> to vector<8xf32>
      %106 = vector.shape_cast %105 : vector<8xf32> to vector<8x1xf32>
      %cst_49 = arith.constant 3.200000e+01 : f32
      %107 = vector.broadcast %cst_49 : f32 to vector<8x1xf32>
      %108 = arith.divf %106, %107 : vector<8x1xf32>
      %109 = vector.broadcast %108 : vector<8x1xf32> to vector<8x32xf32>
      %110 = arith.subf %104, %109 : vector<8x32xf32>
      %111 = arith.mulf %110, %110 : vector<8x32xf32>
      %cst_50 = arith.constant dense<0.000000e+00> : vector<8xf32>
      %112 = vector.multi_reduction <add>, %111, %cst_50 [1] : vector<8x32xf32> to vector<8xf32>
      %113 = vector.shape_cast %112 : vector<8xf32> to vector<8x1xf32>
      %cst_51 = arith.constant 3.100000e+01 : f32
      %114 = vector.broadcast %cst_51 : f32 to vector<8x1xf32>
      %115 = arith.divf %113, %114 : vector<8x1xf32>
      %c0_52 = arith.constant 0 : index
      %c0_53 = arith.constant 0 : index
      %116 = vector.load %arg4[%c0_52, %c0_53] : memref<1x32xf32, #tpu.memory_space<vmem>>, vector<1x32xf32>
      %117 = vector.broadcast %116 : vector<1x32xf32> to vector<8x32xf32>
      %118 = arith.mulf %117, %110 : vector<8x32xf32>
      %119 = math.sqrt %115 : vector<8x1xf32>
      %cst_54 = arith.constant 9.99999997E-7 : f32
      %120 = vector.broadcast %cst_54 : f32 to vector<8x1xf32>
      %121 = arith.addf %119, %120 : vector<8x1xf32>
      %122 = vector.broadcast %121 : vector<8x1xf32> to vector<8x32xf32>
      %123 = arith.divf %118, %122 : vector<8x32xf32>
      %c0_55 = arith.constant 0 : index
      %c0_56 = arith.constant 0 : index
      %124 = vector.load %arg5[%c0_55, %c0_56] : memref<1x32xf32, #tpu.memory_space<vmem>>, vector<1x32xf32>
      %125 = vector.broadcast %124 : vector<1x32xf32> to vector<8x32xf32>
      %126 = arith.addf %123, %125 : vector<8x32xf32>
      %127 = arith.truncf %126 : vector<8x32xf32> to vector<8x32xbf16>
      %c0_57 = arith.constant 0 : index
      %c0_58 = arith.constant 0 : index
      %128 = vector.load %arg6[%c0_57, %c0_58] : memref<32x96xbf16, #tpu.memory_space<vmem>>, vector<32x96xbf16>
      %cst_59 = arith.constant dense<0.000000e+00> : vector<8x96xf32>
      %129 = tpu.matmul %127, %128, %cst_59 {dimension_numbers = #tpu.dot_dimension_numbers<[1], [0], [0], [1], [0, 0, 1, 1], [], []>} : vector<8x32xbf16>, vector<32x96xbf16>, vector<8x96xf32> -> vector<8x96xf32>
      %c0_60 = arith.constant 0 : index
      %c0_61 = arith.constant 0 : index
      %130 = vector.load %arg7[%c0_60, %c0_61] : memref<1x96xf32, #tpu.memory_space<vmem>>, vector<1x96xf32>
      %131 = vector.broadcast %130 : vector<1x96xf32> to vector<8x96xf32>
      %132 = arith.addf %129, %131 : vector<8x96xf32>
      %133 = arith.truncf %132 : vector<8x96xf32> to vector<8x96xbf16>
      %c0_62 = arith.constant 0 : index
      %c0_63 = arith.constant 0 : index
      %134 = vector.load %arg11[%c0_62, %c0_63] : memref<8x96xbf16, #tpu.memory_space<vmem>>, vector<8x96xbf16>
      tpu.vector_store %arg11[%c0_62, %c0_63], %133 {strides = array<i32>} : memref<8x96xbf16, #tpu.memory_space<vmem>>, vector<8x96xbf16>,
    } else {
    }
    %c8_i32 = arith.constant 8 : i32
    %3 = arith.muli %arg1, %c8_i32 : i32
    %4 = tpu.assume_multiple %3, 8 : i32
    %5 = arith.index_cast %4 : i32 to index
    %c0 = arith.constant 0 : index
    %6 = vector.load %arg11[%5, %c0] : memref<8x96xbf16, #tpu.memory_space<vmem>>, vector<8x32xbf16>
    %7 = arith.extf %6 : vector<8x32xbf16> to vector<8x32xf32>
    %cst = arith.constant 0.353553385 : f32
    %8 = vector.broadcast %cst : f32 to vector<8x32xf32>
    %9 = arith.mulf %7, %8 : vector<8x32xf32>
    %10 = arith.truncf %9 : vector<8x32xf32> to vector<8x32xbf16>
    %c0_1 = arith.constant 0 : index
    %c0_2 = arith.constant 0 : index
    %c0_3 = arith.constant 0 : index
    %11 = vector.load %arg3[%c0_1, %c0_2, %c0_3] : memref<1x8x8xbf16, #tpu.memory_space<vmem>>, vector<1x8x8xbf16>
    %12 = vector.shape_cast %11 : vector<1x8x8xbf16> to vector<8x8xbf16>
    %13 = arith.extf %12 : vector<8x8xbf16> to vector<8x8xf32>
    %14 = vector.extract_strided_slice %10 {offsets = [0, 0], sizes = [8, 8], strides = [1, 1]} : vector<8x32xbf16> to vector<8x8xbf16>
    %c0_4 = arith.constant 0 : index
    %c32 = arith.constant 32 : index
    %15 = vector.load %arg11[%c0_4, %c32] : memref<8x96xbf16, #tpu.memory_space<vmem>>, vector<8x8xbf16>
    %c0_5 = arith.constant 0 : index
    %c64 = arith.constant 64 : index
    %16 = vector.load %arg11[%c0_5, %c64] : memref<8x96xbf16, #tpu.memory_space<vmem>>, vector<8x8xbf16>
    %cst_6 = arith.constant dense<0.000000e+00> : vector<8x8xf32>
    %17 = tpu.matmul %14, %15, %cst_6 {dimension_numbers = #tpu.dot_dimension_numbers<[1], [1], [0], [0], [0, 0, 1, 0], [], []>} : vector<8x8xbf16>, vector<8x8xbf16>, vector<8x8xf32> -> vector<8x8xf32>
    %18 = arith.addf %17, %13 : vector<8x8xf32>
    %cst_7 = arith.constant dense<0xFF800000> : vector<8xf32>
    %19 = vector.multi_reduction <maximumf>, %18, %cst_7 [1] : vector<8x8xf32> to vector<8xf32>
    %20 = vector.shape_cast %19 : vector<8xf32> to vector<8x1xf32>
    %21 = vector.broadcast %20 : vector<8x1xf32> to vector<8x8xf32>
    %22 = arith.subf %18, %21 : vector<8x8xf32>
    %23 = math.exp %22 : vector<8x8xf32>
    %cst_8 = arith.constant dense<0.000000e+00> : vector<8xf32>
    %24 = vector.multi_reduction <add>, %23, %cst_8 [1] : vector<8x8xf32> to vector<8xf32>
    %25 = vector.shape_cast %24 : vector<8xf32> to vector<8x1xf32>
    %26 = tpu.reciprocal %25 {approx = true} : vector<8x1xf32> -> vector<8x1xf32>
    %27 = vector.broadcast %26 : vector<8x1xf32> to vector<8x8xf32>
    %28 = arith.mulf %23, %27 : vector<8x8xf32>
    %29 = arith.truncf %28 : vector<8x8xf32> to vector<8x8xbf16>
    %cst_9 = arith.constant dense<0.000000e+00> : vector<8x8xf32>
    %30 = tpu.matmul %29, %16, %cst_9 {dimension_numbers = #tpu.dot_dimension_numbers<[1], [0], [0], [1], [0, 0, 1, 1], [], []>} : vector<8x8xbf16>, vector<8x8xbf16>, vector<8x8xf32> -> vector<8x8xf32>
    %c0_10 = arith.constant 0 : index
    %c0_11 = arith.constant 0 : index
    %31 = vector.load %arg12[%c0_10, %c0_11] : memref<8x32xf32, #tpu.memory_space<vmem>>, vector<8x8xf32>
    tpu.vector_store %arg12[%c0_10, %c0_11], %30 {strides = array<i32>} : memref<8x32xf32, #tpu.memory_space<vmem>>, vector<8x8xf32>,
    %32 = vector.extract_strided_slice %10 {offsets = [0, 8], sizes = [8, 8], strides = [1, 1]} : vector<8x32xbf16> to vector<8x8xbf16>
    %c0_12 = arith.constant 0 : index
    %c40 = arith.constant 40 : index
    %33 = vector.load %arg11[%c0_12, %c40] : memref<8x96xbf16, #tpu.memory_space<vmem>>, vector<8x8xbf16>
    %c0_13 = arith.constant 0 : index
    %c72 = arith.constant 72 : index
    %34 = vector.load %arg11[%c0_13, %c72] : memref<8x96xbf16, #tpu.memory_space<vmem>>, vector<8x8xbf16>
    %cst_14 = arith.constant dense<0.000000e+00> : vector<8x8xf32>
    %35 = tpu.matmul %32, %33, %cst_14 {dimension_numbers = #tpu.dot_dimension_numbers<[1], [1], [0], [0], [0, 0, 1, 0], [], []>} : vector<8x8xbf16>, vector<8x8xbf16>, vector<8x8xf32> -> vector<8x8xf32>
    %36 = arith.addf %35, %13 : vector<8x8xf32>
    %cst_15 = arith.constant dense<0xFF800000> : vector<8xf32>
    %37 = vector.multi_reduction <maximumf>, %36, %cst_15 [1] : vector<8x8xf32> to vector<8xf32>
    %38 = vector.shape_cast %37 : vector<8xf32> to vector<8x1xf32>
    %39 = vector.broadcast %38 : vector<8x1xf32> to vector<8x8xf32>
    %40 = arith.subf %36, %39 : vector<8x8xf32>
    %41 = math.exp %40 : vector<8x8xf32>
    %cst_16 = arith.constant dense<0.000000e+00> : vector<8xf32>
    %42 = vector.multi_reduction <add>, %41, %cst_16 [1] : vector<8x8xf32> to vector<8xf32>
    %43 = vector.shape_cast %42 : vector<8xf32> to vector<8x1xf32>
    %44 = tpu.reciprocal %43 {approx = true} : vector<8x1xf32> -> vector<8x1xf32>
    %45 = vector.broadcast %44 : vector<8x1xf32> to vector<8x8xf32>
    %46 = arith.mulf %41, %45 : vector<8x8xf32>
    %47 = arith.truncf %46 : vector<8x8xf32> to vector<8x8xbf16>
    %cst_17 = arith.constant dense<0.000000e+00> : vector<8x8xf32>
    %48 = tpu.matmul %47, %34, %cst_17 {dimension_numbers = #tpu.dot_dimension_numbers<[1], [0], [0], [1], [0, 0, 1, 1], [], []>} : vector<8x8xbf16>, vector<8x8xbf16>, vector<8x8xf32> -> vector<8x8xf32>
    %c0_18 = arith.constant 0 : index
    %c8 = arith.constant 8 : index
    %49 = vector.load %arg12[%c0_18, %c8] : memref<8x32xf32, #tpu.memory_space<vmem>>, vector<8x8xf32>
    tpu.vector_store %arg12[%c0_18, %c8], %48 {strides = array<i32>} : memref<8x32xf32, #tpu.memory_space<vmem>>, vector<8x8xf32>,
    %50 = vector.extract_strided_slice %10 {offsets = [0, 16], sizes = [8, 8], strides = [1, 1]} : vector<8x32xbf16> to vector<8x8xbf16>
    %c0_19 = arith.constant 0 : index
    %c48 = arith.constant 48 : index
    %51 = vector.load %arg11[%c0_19, %c48] : memref<8x96xbf16, #tpu.memory_space<vmem>>, vector<8x8xbf16>
    %c0_20 = arith.constant 0 : index
    %c80 = arith.constant 80 : index
    %52 = vector.load %arg11[%c0_20, %c80] : memref<8x96xbf16, #tpu.memory_space<vmem>>, vector<8x8xbf16>
    %cst_21 = arith.constant dense<0.000000e+00> : vector<8x8xf32>
    %53 = tpu.matmul %50, %51, %cst_21 {dimension_numbers = #tpu.dot_dimension_numbers<[1], [1], [0], [0], [0, 0, 1, 0], [], []>} : vector<8x8xbf16>, vector<8x8xbf16>, vector<8x8xf32> -> vector<8x8xf32>
    %54 = arith.addf %53, %13 : vector<8x8xf32>
    %cst_22 = arith.constant dense<0xFF800000> : vector<8xf32>
    %55 = vector.multi_reduction <maximumf>, %54, %cst_22 [1] : vector<8x8xf32> to vector<8xf32>
    %56 = vector.shape_cast %55 : vector<8xf32> to vector<8x1xf32>
    %57 = vector.broadcast %56 : vector<8x1xf32> to vector<8x8xf32>
    %58 = arith.subf %54, %57 : vector<8x8xf32>
    %59 = math.exp %58 : vector<8x8xf32>
    %cst_23 = arith.constant dense<0.000000e+00> : vector<8xf32>
    %60 = vector.multi_reduction <add>, %59, %cst_23 [1] : vector<8x8xf32> to vector<8xf32>
    %61 = vector.shape_cast %60 : vector<8xf32> to vector<8x1xf32>
    %62 = tpu.reciprocal %61 {approx = true} : vector<8x1xf32> -> vector<8x1xf32>
    %63 = vector.broadcast %62 : vector<8x1xf32> to vector<8x8xf32>
    %64 = arith.mulf %59, %63 : vector<8x8xf32>
    %65 = arith.truncf %64 : vector<8x8xf32> to vector<8x8xbf16>
    %cst_24 = arith.constant dense<0.000000e+00> : vector<8x8xf32>
    %66 = tpu.matmul %65, %52, %cst_24 {dimension_numbers = #tpu.dot_dimension_numbers<[1], [0], [0], [1], [0, 0, 1, 1], [], []>} : vector<8x8xbf16>, vector<8x8xbf16>, vector<8x8xf32> -> vector<8x8xf32>
    %c0_25 = arith.constant 0 : index
    %c16 = arith.constant 16 : index
    %67 = vector.load %arg12[%c0_25, %c16] : memref<8x32xf32, #tpu.memory_space<vmem>>, vector<8x8xf32>
    tpu.vector_store %arg12[%c0_25, %c16], %66 {strides = array<i32>} : memref<8x32xf32, #tpu.memory_space<vmem>>, vector<8x8xf32>,
    %68 = vector.extract_strided_slice %10 {offsets = [0, 24], sizes = [8, 8], strides = [1, 1]} : vector<8x32xbf16> to vector<8x8xbf16>
    %c0_26 = arith.constant 0 : index
    %c56 = arith.constant 56 : index
    %69 = vector.load %arg11[%c0_26, %c56] : memref<8x96xbf16, #tpu.memory_space<vmem>>, vector<8x8xbf16>
    %c0_27 = arith.constant 0 : index
    %c88 = arith.constant 88 : index
    %70 = vector.load %arg11[%c0_27, %c88] : memref<8x96xbf16, #tpu.memory_space<vmem>>, vector<8x8xbf16>
    %cst_28 = arith.constant dense<0.000000e+00> : vector<8x8xf32>
    %71 = tpu.matmul %68, %69, %cst_28 {dimension_numbers = #tpu.dot_dimension_numbers<[1], [1], [0], [0], [0, 0, 1, 0], [], []>} : vector<8x8xbf16>, vector<8x8xbf16>, vector<8x8xf32> -> vector<8x8xf32>
    %72 = arith.addf %71, %13 : vector<8x8xf32>
    %cst_29 = arith.constant dense<0xFF800000> : vector<8xf32>
    %73 = vector.multi_reduction <maximumf>, %72, %cst_29 [1] : vector<8x8xf32> to vector<8xf32>
    %74 = vector.shape_cast %73 : vector<8xf32> to vector<8x1xf32>
    %75 = vector.broadcast %74 : vector<8x1xf32> to vector<8x8xf32>
    %76 = arith.subf %72, %75 : vector<8x8xf32>
    %77 = math.exp %76 : vector<8x8xf32>
    %cst_30 = arith.constant dense<0.000000e+00> : vector<8xf32>
    %78 = vector.multi_reduction <add>, %77, %cst_30 [1] : vector<8x8xf32> to vector<8xf32>
    %79 = vector.shape_cast %78 : vector<8xf32> to vector<8x1xf32>
    %80 = tpu.reciprocal %79 {approx = true} : vector<8x1xf32> -> vector<8x1xf32>
    %81 = vector.broadcast %80 : vector<8x1xf32> to vector<8x8xf32>
    %82 = arith.mulf %77, %81 : vector<8x8xf32>
    %83 = arith.truncf %82 : vector<8x8xf32> to vector<8x8xbf16>
    %cst_31 = arith.constant dense<0.000000e+00> : vector<8x8xf32>
    %84 = tpu.matmul %83, %70, %cst_31 {dimension_numbers = #tpu.dot_dimension_numbers<[1], [0], [0], [1], [0, 0, 1, 1], [], []>} : vector<8x8xbf16>, vector<8x8xbf16>, vector<8x8xf32> -> vector<8x8xf32>
    %c0_32 = arith.constant 0 : index
    %c24 = arith.constant 24 : index
    %85 = vector.load %arg12[%c0_32, %c24] : memref<8x32xf32, #tpu.memory_space<vmem>>, vector<8x8xf32>
    tpu.vector_store %arg12[%c0_32, %c24], %84 {strides = array<i32>} : memref<8x32xf32, #tpu.memory_space<vmem>>, vector<8x8xf32>,
    %c0_33 = arith.constant 0 : index
    %c0_34 = arith.constant 0 : index
    %86 = vector.load %arg12[%c0_33, %c0_34] : memref<8x32xf32, #tpu.memory_space<vmem>>, vector<8x32xf32>
    %87 = arith.truncf %86 : vector<8x32xf32> to vector<8x32xbf16>
    %c0_35 = arith.constant 0 : index
    %c0_36 = arith.constant 0 : index
    %88 = vector.load %arg8[%c0_35, %c0_36] : memref<32x32xbf16, #tpu.memory_space<vmem>>, vector<32x32xbf16>
    %cst_37 = arith.constant dense<0.000000e+00> : vector<8x32xf32>
    %89 = tpu.matmul %87, %88, %cst_37 {dimension_numbers = #tpu.dot_dimension_numbers<[1], [0], [0], [1], [0, 0, 1, 1], [], []>} : vector<8x32xbf16>, vector<32x32xbf16>, vector<8x32xf32> -> vector<8x32xf32>
    %c0_38 = arith.constant 0 : index
    %c0_39 = arith.constant 0 : index
    %90 = vector.load %arg9[%c0_38, %c0_39] : memref<1x32xf32, #tpu.memory_space<vmem>>, vector<1x32xf32>
    %91 = vector.broadcast %90 : vector<1x32xf32> to vector<8x32xf32>
    %92 = arith.addf %89, %91 : vector<8x32xf32>
    %c0_40 = arith.constant 0 : index
    %93 = arith.index_cast %4 : i32 to index
    %c0_41 = arith.constant 0 : index
    %94 = vector.load %arg2[%c0_40, %93, %c0_41] : memref<1x8x32xbf16, #tpu.memory_space<vmem>>, vector<1x8x32xbf16>
    %95 = vector.shape_cast %94 : vector<1x8x32xbf16> to vector<8x32xbf16>
    %96 = arith.extf %95 : vector<8x32xbf16> to vector<8x32xf32>
    %97 = arith.addf %96, %92 : vector<8x32xf32>
    %98 = arith.truncf %97 : vector<8x32xf32> to vector<8x32xbf16>
    %c0_42 = arith.constant 0 : index
    %c0_43 = arith.constant 0 : index
    %c0_44 = arith.constant 0 : index
    %99 = vector.load %arg10[%c0_42, %c0_43, %c0_44] : memref<1x8x32xbf16, #tpu.memory_space<vmem>>, vector<1x8x32xbf16>
    %100 = vector.shape_cast %99 : vector<1x8x32xbf16> to vector<8x32xbf16>
    %101 = vector.shape_cast %98 : vector<8x32xbf16> to vector<1x8x32xbf16>
    tpu.vector_store %arg10[%c0_42, %c0_43, %c0_44], %101 {strides = array<i32>} : memref<1x8x32xbf16, #tpu.memory_space<vmem>>, vector<1x8x32xbf16>,
    return
  }
  func.func @transform_0(%arg0: i32, %arg1: i32) -> (i32, i32, i32) {
    %c0_i32 = arith.constant 0 : i32
    %c0_i32_0 = arith.constant 0 : i32
    %c0_i32_1 = arith.constant 0 : i32
    return %arg0, %c0_i32, %c0_i32_0 : i32, i32, i32
  }
  func.func @transform_1(%arg0: i32, %arg1: i32) -> (i32, i32, i32) {
    %c0_i32 = arith.constant 0 : i32
    %c0_i32_0 = arith.constant 0 : i32
    return %arg0, %arg1, %c0_i32 : i32, i32, i32
  }
  func.func @transform_2(%arg0: i32, %arg1: i32) -> (i32, i32) {
    %c0_i32 = arith.constant 0 : i32
    %c0_i32_0 = arith.constant 0 : i32
    %c0_i32_1 = arith.constant 0 : i32
    return %c0_i32, %c0_i32_0 : i32, i32
  }
  func.func @transform_3(%arg0: i32, %arg1: i32) -> (i32, i32) {
    %c0_i32 = arith.constant 0 : i32
    %c0_i32_0 = arith.constant 0 : i32
    %c0_i32_1 = arith.constant 0 : i32
    return %c0_i32, %c0_i32_0 : i32, i32
  }
  func.func @transform_4(%arg0: i32, %arg1: i32) -> (i32, i32) {
    %c0_i32 = arith.constant 0 : i32
    %c0_i32_0 = arith.constant 0 : i32
    %c0_i32_1 = arith.constant 0 : i32
    return %c0_i32, %c0_i32_0 : i32, i32
  }
  func.func @transform_5(%arg0: i32, %arg1: i32) -> (i32, i32) {
    %c0_i32 = arith.constant 0 : i32
    %c0_i32_0 = arith.constant 0 : i32
    %c0_i32_1 = arith.constant 0 : i32
    return %c0_i32, %c0_i32_0 : i32, i32
  }
  func.func @transform_6(%arg0: i32, %arg1: i32) -> (i32, i32) {
    %c0_i32 = arith.constant 0 : i32
    %c0_i32_0 = arith.constant 0 : i32
    %c0_i32_1 = arith.constant 0 : i32
    return %c0_i32, %c0_i32_0 : i32, i32
  }
  func.func @transform_7(%arg0: i32, %arg1: i32) -> (i32, i32) {
    %c0_i32 = arith.constant 0 : i32
    %c0_i32_0 = arith.constant 0 : i32
    %c0_i32_1 = arith.constant 0 : i32
    return %c0_i32, %c0_i32_0 : i32, i32
  }
  func.func @transform_8(%arg0: i32, %arg1: i32) -> (i32, i32, i32) {
    %c0_i32 = arith.constant 0 : i32
    %c0_i32_0 = arith.constant 0 : i32
    return %arg0, %arg1, %c0_i32 : i32, i32, i32
  }
}

module attributes {stable_mosaic.version = 11 : i64} {
  func.func @kernel(%arg0: i32, %arg1: memref<16x32xbf16, #tpu.memory_space<vmem>>, %arg2: memref<1x32xf32, #tpu.memory_space<vmem>>, %arg3: memref<1x32xf32, #tpu.memory_space<vmem>>, %arg4: memref<16x32xf32, #tpu.memory_space<vmem>>) attributes {dimension_semantics = [#tpu.dimension_semantics<parallel>], iteration_bounds = array<i64: 1>, scalar_prefetch = 0 : i64, scratch_operands = 0 : i64, tpu.core_type = #tpu.core_type<tc>, window_params = [{transform_indices = @transform_0, window_bounds = array<i64: 16, 32>}, {pipeline_mode = #tpu.pipeline_mode<synchronous>, transform_indices = @transform_1, window_bounds = array<i64: 1, 32>}, {pipeline_mode = #tpu.pipeline_mode<synchronous>, transform_indices = @transform_2, window_bounds = array<i64: 1, 32>}, {transform_indices = @transform_3, window_bounds = array<i64: 16, 32>}]} {
    %c0 = arith.constant 0 : index
    %c0_0 = arith.constant 0 : index
    %0 = vector.load %arg1[%c0, %c0_0] : memref<16x32xbf16, #tpu.memory_space<vmem>>, vector<16x32xbf16>
    %1 = arith.extf %0 : vector<16x32xbf16> to vector<16x32xf32>
    %cst = arith.constant dense<0.000000e+00> : vector<16xf32>
    %2 = vector.multi_reduction <add>, %1, %cst [1] : vector<16x32xf32> to vector<16xf32>
    %3 = vector.shape_cast %2 : vector<16xf32> to vector<16x1xf32>
    %cst_1 = arith.constant 3.200000e+01 : f32
    %4 = vector.broadcast %cst_1 : f32 to vector<16x1xf32>
    %5 = arith.divf %3, %4 : vector<16x1xf32>
    %6 = vector.broadcast %5 : vector<16x1xf32> to vector<16x32xf32>
    %7 = arith.subf %1, %6 : vector<16x32xf32>
    %8 = arith.mulf %7, %7 : vector<16x32xf32>
    %cst_2 = arith.constant dense<0.000000e+00> : vector<16xf32>
    %9 = vector.multi_reduction <add>, %8, %cst_2 [1] : vector<16x32xf32> to vector<16xf32>
    %10 = vector.shape_cast %9 : vector<16xf32> to vector<16x1xf32>
    %cst_3 = arith.constant 3.100000e+01 : f32
    %11 = vector.broadcast %cst_3 : f32 to vector<16x1xf32>
    %12 = arith.divf %10, %11 : vector<16x1xf32>
    %c0_4 = arith.constant 0 : index
    %c0_5 = arith.constant 0 : index
    %13 = vector.load %arg2[%c0_4, %c0_5] : memref<1x32xf32, #tpu.memory_space<vmem>>, vector<1x32xf32>
    %14 = vector.broadcast %13 : vector<1x32xf32> to vector<16x32xf32>
    %15 = arith.mulf %14, %7 : vector<16x32xf32>
    %16 = math.sqrt %12 : vector<16x1xf32>
    %cst_6 = arith.constant 9.99999997E-7 : f32
    %17 = vector.broadcast %cst_6 : f32 to vector<16x1xf32>
    %18 = arith.addf %16, %17 : vector<16x1xf32>
    %19 = vector.broadcast %18 : vector<16x1xf32> to vector<16x32xf32>
    %20 = arith.divf %15, %19 : vector<16x32xf32>
    %c0_7 = arith.constant 0 : index
    %c0_8 = arith.constant 0 : index
    %21 = vector.load %arg3[%c0_7, %c0_8] : memref<1x32xf32, #tpu.memory_space<vmem>>, vector<1x32xf32>
    %22 = vector.broadcast %21 : vector<1x32xf32> to vector<16x32xf32>
    %23 = arith.addf %20, %22 : vector<16x32xf32>
    %c0_9 = arith.constant 0 : index
    %c0_10 = arith.constant 0 : index
    %24 = vector.load %arg4[%c0_9, %c0_10] : memref<16x32xf32, #tpu.memory_space<vmem>>, vector<16x32xf32>
    tpu.vector_store %arg4[%c0_9, %c0_10], %23 {strides = array<i32>} : memref<16x32xf32, #tpu.memory_space<vmem>>, vector<16x32xf32>,
    return
  }
  func.func @transform_0(%arg0: i32) -> (i32, i32) {
    %c0_i32 = arith.constant 0 : i32
    %c0_i32_0 = arith.constant 0 : i32
    return %arg0, %c0_i32 : i32, i32
  }
  func.func @transform_1(%arg0: i32) -> (i32, i32) {
    %c0_i32 = arith.constant 0 : i32
    %c0_i32_0 = arith.constant 0 : i32
    %c0_i32_1 = arith.constant 0 : i32
    return %c0_i32, %c0_i32_0 : i32, i32
  }
  func.func @transform_2(%arg0: i32) -> (i32, i32) {
    %c0_i32 = arith.constant 0 : i32
    %c0_i32_0 = arith.constant 0 : i32
    %c0_i32_1 = arith.constant 0 : i32
    return %c0_i32, %c0_i32_0 : i32, i32
  }
  func.func @transform_3(%arg0: i32) -> (i32, i32) {
    %c0_i32 = arith.constant 0 : i32
    %c0_i32_0 = arith.constant 0 : i32
    return %arg0, %c0_i32 : i32, i32
  }
}

module attributes {stable_mosaic.version = 11 : i64} {
  func.func @kernel(%arg0: i32, %arg1: memref<16x32xbf16, #tpu.memory_space<vmem>>, %arg2: memref<1x32xf32, #tpu.memory_space<vmem>>, %arg3: memref<1x32xf32, #tpu.memory_space<vmem>>, %arg4: memref<32x64xbf16, #tpu.memory_space<vmem>>, %arg5: memref<1x64xf32, #tpu.memory_space<vmem>>, %arg6: memref<64x32xbf16, #tpu.memory_space<vmem>>, %arg7: memref<1x32xf32, #tpu.memory_space<vmem>>, %arg8: memref<16x32xbf16, #tpu.memory_space<vmem>>) attributes {dimension_semantics = [#tpu.dimension_semantics<parallel>], iteration_bounds = array<i64: 1>, scalar_prefetch = 0 : i64, scratch_operands = 0 : i64, tpu.core_type = #tpu.core_type<tc>, window_params = [{transform_indices = @transform_0, window_bounds = array<i64: 16, 32>}, {pipeline_mode = #tpu.pipeline_mode<synchronous>, transform_indices = @transform_1, window_bounds = array<i64: 1, 32>}, {pipeline_mode = #tpu.pipeline_mode<synchronous>, transform_indices = @transform_2, window_bounds = array<i64: 1, 32>}, {pipeline_mode = #tpu.pipeline_mode<synchronous>, transform_indices = @transform_3, window_bounds = array<i64: 32, 64>}, {pipeline_mode = #tpu.pipeline_mode<synchronous>, transform_indices = @transform_4, window_bounds = array<i64: 1, 64>}, {pipeline_mode = #tpu.pipeline_mode<synchronous>, transform_indices = @transform_5, window_bounds = array<i64: 64, 32>}, {pipeline_mode = #tpu.pipeline_mode<synchronous>, transform_indices = @transform_6, window_bounds = array<i64: 1, 32>}, {transform_indices = @transform_7, window_bounds = array<i64: 16, 32>}]} {
    %c0 = arith.constant 0 : index
    %c0_0 = arith.constant 0 : index
    %0 = vector.load %arg1[%c0, %c0_0] : memref<16x32xbf16, #tpu.memory_space<vmem>>, vector<16x32xbf16>
    %1 = arith.extf %0 : vector<16x32xbf16> to vector<16x32xf32>
    %cst = arith.constant dense<0.000000e+00> : vector<16xf32>
    %2 = vector.multi_reduction <add>, %1, %cst [1] : vector<16x32xf32> to vector<16xf32>
    %3 = vector.shape_cast %2 : vector<16xf32> to vector<16x1xf32>
    %cst_1 = arith.constant 3.200000e+01 : f32
    %4 = vector.broadcast %cst_1 : f32 to vector<16x1xf32>
    %5 = arith.divf %3, %4 : vector<16x1xf32>
    %6 = vector.broadcast %5 : vector<16x1xf32> to vector<16x32xf32>
    %7 = arith.subf %1, %6 : vector<16x32xf32>
    %8 = arith.mulf %7, %7 : vector<16x32xf32>
    %cst_2 = arith.constant dense<0.000000e+00> : vector<16xf32>
    %9 = vector.multi_reduction <add>, %8, %cst_2 [1] : vector<16x32xf32> to vector<16xf32>
    %10 = vector.shape_cast %9 : vector<16xf32> to vector<16x1xf32>
    %cst_3 = arith.constant 3.100000e+01 : f32
    %11 = vector.broadcast %cst_3 : f32 to vector<16x1xf32>
    %12 = arith.divf %10, %11 : vector<16x1xf32>
    %c0_4 = arith.constant 0 : index
    %c0_5 = arith.constant 0 : index
    %13 = vector.load %arg2[%c0_4, %c0_5] : memref<1x32xf32, #tpu.memory_space<vmem>>, vector<1x32xf32>
    %14 = vector.broadcast %13 : vector<1x32xf32> to vector<16x32xf32>
    %15 = arith.mulf %14, %7 : vector<16x32xf32>
    %16 = math.sqrt %12 : vector<16x1xf32>
    %cst_6 = arith.constant 9.99999997E-7 : f32
    %17 = vector.broadcast %cst_6 : f32 to vector<16x1xf32>
    %18 = arith.addf %16, %17 : vector<16x1xf32>
    %19 = vector.broadcast %18 : vector<16x1xf32> to vector<16x32xf32>
    %20 = arith.divf %15, %19 : vector<16x32xf32>
    %c0_7 = arith.constant 0 : index
    %c0_8 = arith.constant 0 : index
    %21 = vector.load %arg3[%c0_7, %c0_8] : memref<1x32xf32, #tpu.memory_space<vmem>>, vector<1x32xf32>
    %22 = vector.broadcast %21 : vector<1x32xf32> to vector<16x32xf32>
    %23 = arith.addf %20, %22 : vector<16x32xf32>
    %24 = arith.truncf %23 : vector<16x32xf32> to vector<16x32xbf16>
    %c0_9 = arith.constant 0 : index
    %c0_10 = arith.constant 0 : index
    %25 = vector.load %arg4[%c0_9, %c0_10] : memref<32x64xbf16, #tpu.memory_space<vmem>>, vector<32x64xbf16>
    %cst_11 = arith.constant dense<0.000000e+00> : vector<16x64xf32>
    %26 = tpu.matmul %24, %25, %cst_11 {dimension_numbers = #tpu.dot_dimension_numbers<[1], [0], [0], [1], [0, 0, 1, 1], [], []>} : vector<16x32xbf16>, vector<32x64xbf16>, vector<16x64xf32> -> vector<16x64xf32>
    %c0_12 = arith.constant 0 : index
    %c0_13 = arith.constant 0 : index
    %27 = vector.load %arg5[%c0_12, %c0_13] : memref<1x64xf32, #tpu.memory_space<vmem>>, vector<1x64xf32>
    %28 = vector.broadcast %27 : vector<1x64xf32> to vector<16x64xf32>
    %29 = arith.addf %26, %28 : vector<16x64xf32>
    %cst_14 = arith.constant 0.000000e+00 : f32
    %30 = vector.broadcast %cst_14 : f32 to vector<16x64xf32>
    %31 = arith.maximumf %29, %30 : vector<16x64xf32>
    %32 = arith.truncf %31 : vector<16x64xf32> to vector<16x64xbf16>
    %c0_15 = arith.constant 0 : index
    %c0_16 = arith.constant 0 : index
    %33 = vector.load %arg6[%c0_15, %c0_16] : memref<64x32xbf16, #tpu.memory_space<vmem>>, vector<64x32xbf16>
    %cst_17 = arith.constant dense<0.000000e+00> : vector<16x32xf32>
    %34 = tpu.matmul %32, %33, %cst_17 {dimension_numbers = #tpu.dot_dimension_numbers<[1], [0], [0], [1], [0, 0, 1, 1], [], []>} : vector<16x64xbf16>, vector<64x32xbf16>, vector<16x32xf32> -> vector<16x32xf32>
    %c0_18 = arith.constant 0 : index
    %c0_19 = arith.constant 0 : index
    %35 = vector.load %arg7[%c0_18, %c0_19] : memref<1x32xf32, #tpu.memory_space<vmem>>, vector<1x32xf32>
    %36 = vector.broadcast %35 : vector<1x32xf32> to vector<16x32xf32>
    %37 = arith.addf %34, %36 : vector<16x32xf32>
    %38 = arith.addf %1, %37 : vector<16x32xf32>
    %39 = arith.truncf %38 : vector<16x32xf32> to vector<16x32xbf16>
    %c0_20 = arith.constant 0 : index
    %c0_21 = arith.constant 0 : index
    %40 = vector.load %arg8[%c0_20, %c0_21] : memref<16x32xbf16, #tpu.memory_space<vmem>>, vector<16x32xbf16>
    tpu.vector_store %arg8[%c0_20, %c0_21], %39 {strides = array<i32>} : memref<16x32xbf16, #tpu.memory_space<vmem>>, vector<16x32xbf16>,
    return
  }
  func.func @transform_0(%arg0: i32) -> (i32, i32) {
    %c0_i32 = arith.constant 0 : i32
    %c0_i32_0 = arith.constant 0 : i32
    return %arg0, %c0_i32 : i32, i32
  }
  func.func @transform_1(%arg0: i32) -> (i32, i32) {
    %c0_i32 = arith.constant 0 : i32
    %c0_i32_0 = arith.constant 0 : i32
    %c0_i32_1 = arith.constant 0 : i32
    return %c0_i32, %c0_i32_0 : i32, i32
  }
  func.func @transform_2(%arg0: i32) -> (i32, i32) {
    %c0_i32 = arith.constant 0 : i32
    %c0_i32_0 = arith.constant 0 : i32
    %c0_i32_1 = arith.constant 0 : i32
    return %c0_i32, %c0_i32_0 : i32, i32
  }
  func.func @transform_3(%arg0: i32) -> (i32, i32) {
    %c0_i32 = arith.constant 0 : i32
    %c0_i32_0 = arith.constant 0 : i32
    %c0_i32_1 = arith.constant 0 : i32
    return %c0_i32, %c0_i32_0 : i32, i32
  }
  func.func @transform_4(%arg0: i32) -> (i32, i32) {
    %c0_i32 = arith.constant 0 : i32
    %c0_i32_0 = arith.constant 0 : i32
    %c0_i32_1 = arith.constant 0 : i32
    return %c0_i32, %c0_i32_0 : i32, i32
  }
  func.func @transform_5(%arg0: i32) -> (i32, i32) {
    %c0_i32 = arith.constant 0 : i32
    %c0_i32_0 = arith.constant 0 : i32
    %c0_i32_1 = arith.constant 0 : i32
    return %c0_i32, %c0_i32_0 : i32, i32
  }
  func.func @transform_6(%arg0: i32) -> (i32, i32) {
    %c0_i32 = arith.constant 0 : i32
    %c0_i32_0 = arith.constant 0 : i32
    %c0_i32_1 = arith.constant 0 : i32
    return %c0_i32, %c0_i32_0 : i32, i32
  }
  func.func @transform_7(%arg0: i32) -> (i32, i32) {
    %c0_i32 = arith.constant 0 : i32
    %c0_i32_0 = arith.constant 0 : i32
    return %arg0, %c0_i32 : i32, i32
  }
}

</mosaic_0001>

<bundles_post_ra>
// kernel: _lambda_.1
= control target key start
LH: loop header
LB: loop body
LE: loop exit
PB: predicated region body
PF: predicated region fallthrough
CT: control target
= control target key end

     0   :  { %vm19_vm0 = vcmask 261120   ;;  %s189_s0 = inlined_call_operand.vmem [shape: bf16[16,32], index: 0, kind: input, shape index: {}]   ;;  %s190_s1 = inlined_call_operand.vmem [shape: f32[1,32], index: 1, kind: input, shape index: {}]   ;;  %s191_s2 = inlined_call_operand.vmem [shape: f32[1,32], index: 2, kind: input, shape index: {}]   ;;  %s192_s3 = inlined_call_operand.hbm [shape: f32[16,32], index: 3, kind: output, shape index: {}]  }
   0x1   :  { %v101_v0 = vld [vmem:[%s189_s0] sm:$0xff]  }
   0x2   :  { %8 = vsyncpa [#allocation3], 0  ;;  %v102_v1 = vunpack.c.l.bf16 %v101_v0  ;;  %v103_v2 = vunpack.c.h.bf16 %v101_v0  ;;  %v98_v31 = vld [vmem:[%s190_s1] ss:$0 sm:$0xff]  ;;  %s139_s17 = smov [#allocation2]  }
   0x3   :  { %v99_v34 = vld [vmem:[%s191_s2] ss:$0 sm:$0xff]  ;;  %s87_s18 = sshll.u32 %s139_s17, 4  ;;  %s88_s18 = int_to_ptr.vmem [resolvable:$true] %s87_s18 }
   0x4   :  { %v20_v3 = vsel %vm19_vm0, %v102_v1, 0.0  ;;  %v23_v4 = vsel %vm19_vm0, %v103_v2, 0.0  ;;  %s115_s1 = scalar_lea.vmem %s88_s18, 256  ;;  %p120_p1 = scmp.lt.s32.totalorder %s88_s18, %s88_s18 }
   0x5   :  { %21 = vadd.xlane.f32.xlu0 %v20_v3  ;;  %p116_p0 = scmp.ne.s32.totalorder %s88_s18, %s115_s1  ;;  %p121_p2 = scmp.lt.s32.totalorder %s115_s1, %s115_s1 }
   0x7   :  { %p122_p3 = por %p121_p2, %p120_p1 }
   0x9   :  { %24 = vadd.xlane.f32.xlu0 %v23_v4  ;;  %p123_p4 = pnand %p122_p3, %p116_p0 }
  0x92   :  { %v22_v5 = vpop.xlane.xlu0 %21 }
  0x93   :  { %v27_v6 = vmul.f32 0.03125, %v22_v5 }
  0x95   :  { %v29_v7 = vsub.f32 %v102_v1, %v27_v6 }
  0x96   :  { %v25_v8 = vpop.xlane.xlu0 %24 }
  0x97   :  { %v28_v9 = vmul.f32 0.03125, %v25_v8  ;;  %v31_v10 = vmul.f32 %v29_v7, %v29_v7  ;;  %v49_v32 = vmul.f32 %v98_v31, %v29_v7 }
  0x99   :  { %v30_v11 = vsub.f32 %v103_v2, %v28_v9  ;;  %v33_v12 = vsel %vm19_vm0, %v31_v10, 0.0 }
  0x9a   :  { %34 = vadd.xlane.f32.xlu1 %v33_v12 }
  0x9b   :  { %v32_v13 = vmul.f32 %v30_v11, %v30_v11  ;;  %v50_v36 = vmul.f32 %v98_v31, %v30_v11 }
  0x9d   :  { %v36_v14 = vsel %vm19_vm0, %v32_v13, 0.0 }
  0x9e   :  { %37 = vadd.xlane.f32.xlu1 %v36_v14 }
 0x127   :  { %v35_v15 = vpop.xlane.xlu1 %34 }
 0x128   :  { %v40_v16 = vmul.f32 0.032258064, %v35_v15 }
 0x12a   :  { %107 = vrsqrt.f32 %v40_v16  ;;  %vm53_vm1 = vcmp.eq.f32.partialorder %v40_v16, inf  ;;  %v56_v21 = vand.u32 2147483648, %v40_v16  ;;  %vm55_vm2 = vcmp.eq.f32.partialorder %v40_v16, 0.0 }
 0x12b   :  { %v38_v17 = vpop.xlane.xlu1 %37 }
 0x12c   :  { %v41_v18 = vmul.f32 0.032258064, %v38_v17 }
 0x12e   :  { %109 = vrsqrt.f32 %v41_v18  ;;  %vm60_vm3 = vcmp.eq.f32.partialorder %v41_v18, inf  ;;  %v63_v27 = vand.u32 2147483648, %v41_v18  ;;  %vm62_vm4 = vcmp.eq.f32.partialorder %v41_v18, 0.0 }
 0x134   :  { %v108_v19 = vpop.eup %107 }
 0x135   :  { %v52_v20 = vmul.f32 %v108_v19, %v40_v16 }
 0x137   :  { %v54_v22 = vsel %vm53_vm1, %v40_v16, %v52_v20 }
 0x138   :  { %v110_v23 = vpop.eup %109  ;;  %v57_v24 = vsel %vm55_vm2, %v56_v21, %v54_v22 }
 0x139   :  { %v65_v25 = vadd.f32 1e-06, %v57_v24  ;;  %v59_v26 = vmul.f32 %v110_v23, %v41_v18 }
 0x13b   :  { %111 = vrcp.f32 %v65_v25  ;;  %v61_v28 = vsel %vm60_vm3, %v41_v18, %v59_v26 }
 0x13c   :  { %v64_v29 = vsel %vm62_vm4, %v63_v27, %v61_v28 }
 0x13d   :  { %v66_v30 = vadd.f32 1e-06, %v64_v29 }
 0x13f   :  { %113 = vrcp.f32 %v66_v30 }
 0x145   :  { %v112_v33 = vpop.eup %111 }
 0x146   :  { %v68_v35 = vmul.f32 %v112_v33, %v49_v32 }
 0x148   :  { %v78_v37 = vadd.f32 %v99_v34, %v68_v35 }
 0x149   :  { %v114_v38 = vpop.eup %113 }
 0x14a   :  { %v70_v39 = vmul.f32 %v114_v38, %v50_v36  ;;  %80 = vst.msk [vmem:[#allocation2] sm:$0xff] %vm19_vm0, %v78_v37 }
 0x14c   :  { %v79_v40 = vadd.f32 %v99_v34, %v70_v39 }
 0x14e   :  { %81 = vst.msk [vmem:[#allocation2 + $0x8] sm:$0xff] %vm19_vm0, %v79_v40 }
 0x14f   :  { %126 = shalt.err (!%p123_p4)
}
 0x150   :  { %s127_s20 = scalar_lea.hbm %s192_s3, 256 }
 0x151   :  { %p128_p5 = scmp.ne.s32.totalorder %s192_s3, %s127_s20  ;;  %p131_p6 = scmp.lt.u32.totalorder %s127_s20, %s192_s3 }
 0x153   :  { %p133_p7 = pnand %p131_p6, %p128_p5 }
 0x155   :  { %136 = shalt.err (!%p133_p7)
}
 0x156   :  { %s140_s25 = smov 128   ;;  %s141_s26 = smov 8  }
 0x157   :  { %93 = dma.vmem_to_hbm [thread:$0]  %s88_s18, 256, %s192_s3, [#allocation3], %s140_s25, %s140_s25, %s141_s26  }
 0x158   :  { %137 = dma.done.wait [#allocation3], 256  }
 0x159   :  { %138 = vsyncadd [#allocation3], 4294967040 }
 0x15a   :  { %97 = vsyncpa [#allocation3], 1 }

// kernel: closed_call.8
= control target key start
LH: loop header
LB: loop body
LE: loop exit
PB: predicated region body
PF: predicated region fallthrough
CT: control target
= control target key end

     0   :  { %vm31_vm0 = vcmask 261120   ;;  %v328_v15 = vmov 0.0   ;;  %vm329_vm1 = vmmov 0   ;;  %vm202_vm6 = vcmask 523264   ;;  %s424_s0 = inlined_call_operand.vmem [shape: bf16[16,32], index: 0, kind: input, shape index: {}]   ;;  %s425_s3 = inlined_call_operand.vmem [shape: bf16[32,64], index: 3, kind: input, shape index: {}]   ;;  %s426_s5 = inlined_call_operand.vmem [shape: bf16[64,32], index: 5, kind: input, shape index: {}]   ;;  %s427_s1 = inlined_call_operand.vmem [shape: f32[1,32], index: 1, kind: input, shape index: {}]   ;;  %s428_s2 = inlined_call_operand.vmem [shape: f32[1,32], index: 2, kind: input, shape index: {}]   ;;  %s429_s4 = inlined_call_operand.vmem [shape: f32[1,64], index: 4, kind: input, shape index: {}]   ;;  %s430_s6 = inlined_call_operand.vmem [shape: f32[1,32], index: 6, kind: input, shape index: {}]   ;;  %s431_s7 = inlined_call_operand.vmem [shape: bf16[16,32], index: 7, kind: output, shape index: {}]  }
   0x1   :  { %v281_v0 = vld [vmem:[%s424_s0] sm:$0xff]   ;;  %292 = vmatprep.subr.bf16.mxu0 %v328_v15  ;;  %296 = vmatprep.mubr.msk.bf16.mxu0 %vm329_vm1, %v328_v15  ;;  %v315_v17 = vld [vmem:[%s425_s3 + $0x8] sm:$0xff]   ;;  %v318_v47 = vld [vmem:[%s426_s5 + $0x10] sm:$0xff]   ;;  %vm257_vm7 = vcmask 257024  }
   0x2   :  { %v373_v1 = vunpack.c.l.bf16 %v281_v0  ;;  %v375_v2 = vunpack.c.h.bf16 %v281_v0  ;;  %v314_v16 = vld [vmem:[%s425_s3] sm:$0xff]   ;;  %300 = vmatprep.subr.bf16.mxu1 %v328_v15  ;;  %308 = vmatprep.mubr.msk.bf16.mxu1 %vm329_vm1, %v328_v15  ;;  %v317_v19 = vld [vmem:[%s426_s5 + $0x8] sm:$0xff]   ;;  %v319_v48 = vld [vmem:[%s426_s5 + $0x18] sm:$0xff]  }
   0x3   :  { %293 = vmatpush3.bf16.msra.mxu0 %v314_v16  ;;  %v316_v18 = vld [vmem:[%s426_s5] sm:$0xff]  }
   0x4   :  { %v32_v3 = vsel %vm31_vm0, %v373_v1, 0.0  ;;  %v35_v4 = vsel %vm31_vm0, %v375_v2, 0.0  ;;  %294 = vmatprep.subr.bf16.mxu0 %v328_v15  ;;  %301 = vmatpush3.bf16.msra.mxu1 %v316_v18  ;;  %v264_v36 = vld [vmem:[%s427_s1] ss:$0 sm:$0xff] }
   0x5   :  { %33 = vadd.xlane.f32.xlu0 %v32_v3  ;;  %302 = vmatprep.subr.bf16.mxu1 %v328_v15  ;;  %v265_v42 = vld [vmem:[%s428_s2] ss:$0 sm:$0xff] }
   0x6   :  { %v266_v49 = vld [vmem:[%s429_s4] ss:$0 sm:$0xff] }
   0x7   :  { %295 = vmatpush3.bf16.msra.mxu0 %v315_v17  ;;  %v270_v59 = vld [vmem:[%s430_s6] ss:$0 sm:$0xff] }
   0x8   :  { %303 = vmatpush3.bf16.msra.mxu1 %v317_v19 }
   0x9   :  { %36 = vadd.xlane.f32.xlu0 %v35_v4  ;;  %304 = vmatprep.subr.bf16.mxu1 %v328_v15 }
   0xc   :  { %305 = vmatpush3.bf16.msra.mxu1 %v318_v47 }
   0xd   :  { %306 = vmatprep.subr.bf16.mxu1 %v328_v15 }
  0x10   :  { %307 = vmatpush3.bf16.msra.mxu1 %v319_v48 }
  0x92   :  { %v34_v5 = vpop.xlane.xlu0 %33 }
  0x93   :  { %v39_v6 = vmul.f32 0.03125, %v34_v5 }
  0x95   :  { %v41_v7 = vsub.f32 %v373_v1, %v39_v6 }
  0x96   :  { %v37_v8 = vpop.xlane.xlu0 %36 }
  0x97   :  { %v40_v9 = vmul.f32 0.03125, %v37_v8  ;;  %v43_v10 = vmul.f32 %v41_v7, %v41_v7  ;;  %v61_v38 = vmul.f32 %v264_v36, %v41_v7 }
  0x99   :  { %v42_v11 = vsub.f32 %v375_v2, %v40_v9  ;;  %v45_v12 = vsel %vm31_vm0, %v43_v10, 0.0 }
  0x9a   :  { %46 = vadd.xlane.f32.xlu1 %v45_v12 }
  0x9b   :  { %v44_v13 = vmul.f32 %v42_v11, %v42_v11  ;;  %v62_v39 = vmul.f32 %v264_v36, %v42_v11 }
  0x9d   :  { %v48_v14 = vsel %vm31_vm0, %v44_v13, 0.0 }
  0x9e   :  { %49 = vadd.xlane.f32.xlu1 %v48_v14 }
 0x127   :  { %v47_v20 = vpop.xlane.xlu1 %46 }
 0x128   :  { %v52_v21 = vmul.f32 0.032258064, %v47_v20 }
 0x12a   :  { %320 = vrsqrt.f32 %v52_v21  ;;  %vm65_vm2 = vcmp.eq.f32.partialorder %v52_v21, inf  ;;  %v68_v26 = vand.u32 2147483648, %v52_v21  ;;  %vm67_vm3 = vcmp.eq.f32.partialorder %v52_v21, 0.0 }
 0x12b   :  { %v50_v22 = vpop.xlane.xlu1 %49 }
 0x12c   :  { %v53_v23 = vmul.f32 0.032258064, %v50_v22 }
 0x12e   :  { %322 = vrsqrt.f32 %v53_v23  ;;  %vm72_vm4 = vcmp.eq.f32.partialorder %v53_v23, inf  ;;  %v75_v32 = vand.u32 2147483648, %v53_v23  ;;  %vm74_vm5 = vcmp.eq.f32.partialorder %v53_v23, 0.0 }
 0x134   :  { %v321_v24 = vpop.eup %320 }
 0x135   :  { %v64_v25 = vmul.f32 %v321_v24, %v52_v21 }
 0x137   :  { %v66_v27 = vsel %vm65_vm2, %v52_v21, %v64_v25 }
 0x138   :  { %v323_v28 = vpop.eup %322  ;;  %v69_v29 = vsel %vm67_vm3, %v68_v26, %v66_v27 }
 0x139   :  { %v77_v30 = vadd.f32 1e-06, %v69_v29  ;;  %v71_v31 = vmul.f32 %v323_v28, %v53_v23 }
 0x13b   :  { %324 = vrcp.f32 %v77_v30  ;;  %v73_v33 = vsel %vm72_vm4, %v53_v23, %v71_v31 }
 0x13c   :  { %v76_v34 = vsel %vm74_vm5, %v75_v32, %v73_v33 }
 0x13d   :  { %v78_v35 = vadd.f32 1e-06, %v76_v34 }
 0x13f   :  { %326 = vrcp.f32 %v78_v35 }
 0x145   :  { %v325_v37 = vpop.eup %324 }
 0x146   :  { %v80_v40 = vmul.f32 %v325_v37, %v61_v38 }
 0x148   :  { %v90_v44 = vadd.f32 %v265_v42, %v80_v40 }
 0x149   :  { %v327_v41 = vpop.eup %326 }
 0x14a   :  { %v82_v43 = vmul.f32 %v327_v41, %v62_v39 }
 0x14c   :  { %v91_v45 = vadd.f32 %v265_v42, %v82_v43 }
 0x14e   :  { %v92_v46 = vpack.c.bf16 %v91_v45, %v90_v44 }
 0x150   :  { %297 = vmatmul.mubr.msk.bf16.vlgmr.msra.gmra.mrb[0].mxu0 %vm31_vm0, %v92_v46 }
 0x223   :  { %v153_v50 = vpop.f32.mrb[0].mxu0 }
 0x224   :  { %v154_v51 = vadd.f32 %v266_v49, %v153_v50  ;;  %v298_v52 = vpop.f32.mrb[1].mxu0 }
 0x225   :  { %v156_v53 = vpop.f32.mrb[2].mxu0 }
 0x226   :  { %v157_v54 = vadd.f32 %v266_v49, %v156_v53  ;;  %v299_v55 = vpop.f32.mrb[3].mxu0  ;;  %v160_v56 = vmax.f32 %v154_v51, 0.0 }
 0x228   :  { %v161_v57 = vmax.f32 %v157_v54, 0.0 }
 0x22a   :  { %v162_v58 = vpack.c.bf16 %v161_v57, %v160_v56 }
 0x22c   :  { %309 = vmatmul.mubr.msk.bf16.vlgmr.msra.gmra.mrb[0].mxu1 %vm202_vm6, %v162_v58 }
 0x2ff   :  { %v240_v60 = vpop.f32.mrb[0].mxu1 }
 0x300   :  { %v241_v61 = vadd.f32 %v270_v59, %v240_v60  ;;  %v310_v62 = vpop.f32.mrb[1].mxu1 }
 0x301   :  { %v243_v63 = vpop.f32.mrb[2].mxu1 }
 0x302   :  { %v247_v0 = vadd.f32 %v373_v1, %v241_v61  ;;  %v244_v3 = vadd.f32 %v270_v59, %v243_v63  ;;  %v311_v4 = vpop.f32.mrb[3].mxu1 }
 0x304   :  { %v278_v5 = vpack.c.bf16 %v247_v0, %v247_v0  ;;  %v248_v6 = vadd.f32 %v375_v2, %v244_v3 }
 0x306   :  { %258 = vst.msk [vmem:[%s431_s7] sm:$0xf] %vm257_vm7, %v278_v5  ;;  %v279_v7 = vpack.c.bf16 %v248_v6, %v248_v6 }
 0x308   :  { %259 = vst.msk [vmem:[%s431_s7 + $0x4] sm:$0xf] %vm257_vm7, %v279_v7 }

// kernel: closed_call.7
= control target key start
LH: loop header
LB: loop body
LE: loop exit
PB: predicated region body
PF: predicated region fallthrough
CT: control target
= control target key end

     0   :  { %s1390_s27 = smov 0   ;;  %s1392_s28 = smov 0   ;;  %s1536_s0 = inlined_call_operand.vmem [shape: bf16[2,8,32], index: 0, kind: input, shape index: {}]   ;;  %s1537_s1 = inlined_call_operand.vmem [shape: bf16[2,8,8], index: 1, kind: input, shape index: {}]   ;;  %s1538_s2 = inlined_call_operand.vmem [shape: f32[1,32], index: 2, kind: input, shape index: {}]   ;;  %s1539_s3 = inlined_call_operand.vmem [shape: f32[1,32], index: 3, kind: input, shape index: {}]   ;;  %s1540_s4 = inlined_call_operand.vmem [shape: bf16[32,96], index: 4, kind: input, shape index: {}]   ;;  %s1541_s5 = inlined_call_operand.vmem [shape: f32[1,96], index: 5, kind: input, shape index: {}]   ;;  %s1542_s6 = inlined_call_operand.vmem [shape: bf16[32,32], index: 6, kind: input, shape index: {}]   ;;  %s1543_s7 = inlined_call_operand.vmem [shape: f32[1,32], index: 7, kind: input, shape index: {}]   ;;  %s1544_s8 = inlined_call_operand.vmem [shape: bf16[2,8,32], index: 8, kind: output, shape index: {}]  }
   0x1   :  { %s1394_s29 = smov 0  }
   0x2 LB: > { %s30_s30 = sadd.s32 1, %s1323_s28  ;;  %p1123_p0 = scmp.ge.s32.totalorder %s1327_s29, 1  ;;  %s1327_s29 = sphi %s1394_s29, %s18_s29   ;;  %s1323_s28 = sphi %s1392_s28, %s1546_s28   ;;  %s1319_s27 = sphi %s1390_s27, %s1545_s27  }
   0x3   : > { %p32_p1 = scmp.ge.s32.totalorder %s30_s30, 2  ;;  %p289_p2 = scmp.lt.s32.totalorder %s1327_s29, 3 }
   0x5   : > { %s1548_s30 = smov (%p32_p1, %s30_s30), 0  ;;  %p290_p3 = pnand %p1123_p0, %p289_p2 }
   0x6   : > { %p331_p4 = scmp.lt.s32.totalorder (!%p290_p3), %s1319_s27, 1  ;;  %vm356_vm0 = vcmask (!%p290_p3), 261120   ;;  %v1277_v8 = vld [vmem:[%s1540_s4] sm:$0xff] (!%p290_p3)   ;;  %v1329_v9 = vmov (!%p290_p3), 0.0   ;;  %vm1330_vm1 = vmmov (!%p290_p3), 0   ;;  %v1278_v10 = vld [vmem:[%s1540_s4 + $0x8] sm:$0xff] (!%p290_p3)  }
   0x7   : > { %293 = sbr.rel (%p290_p3) target bundleno = 1842 (0x732), region = 52  ;;  %1173 = vmatprep.subr.bf16.mxu0 (!%p290_p3), %v1329_v9  ;;  %1177 = vmatprep.mubr.msk.bf16.mxu0 (!%p290_p3), %vm1330_vm1, %v1329_v9  ;;  %v1127_v19 = vld [vmem:[%s1538_s2] ss:$0 sm:$0xff] (!%p290_p3)  ;;  %vm463_vm4 = vcmask (!%p290_p3), 781312   ;;  %s1331_s23 = smov (!%p290_p3), 96   ;;  %vm482_vm5 = vcmask (!%p290_p3), 64512  }
   0x8   : > { %1174 = vmatpush3.bf16.msra.mxu0 (!%p290_p3), %v1277_v8  ;;  %1181 = vmatprep.subr.bf16.mxu1 (!%p290_p3), %v1329_v9  ;;  %v1128_v22 = vld [vmem:[%s1539_s3] ss:$0 sm:$0xff] (!%p290_p3)  ;;  %s1332_s24 = smov (!%p290_p3), 88   ;;  %s1333_s25 = smov (!%p290_p3), 120   ;;  %vm546_vm6 = vcmask (!%p290_p3), 1043456   ;;  %vm710_vm7 = vcmask (!%p290_p3), 130112  }
   0x9   : > { %1175 = vmatprep.subr.bf16.mxu0 (!%p290_p3), %v1329_v9  ;;  %1183 = vmatprep.mubr.msk.bf16.mxu1 (!%p290_p3), %vm1330_vm1, %v1329_v9  ;;  %v1129_v26 = vld [vmem:[%s1541_s5] ss:$0 sm:$0xff] (!%p290_p3)  ;;  %s1334_s26 = smov (!%p290_p3), 80   ;;  %s1336_s10 = smov (!%p290_p3), 72   ;;  %vm830_vm8 = vcmask (!%p290_p3), 195712   ;;  %vm950_vm9 = vcmask (!%p290_p3), 261312  }
   0xa   : > { %s1337_s11 = smov (!%p290_p3), 104   ;;  %s1338_s16 = smov (!%p290_p3), 64   ;;  %vm1027_vm10 = vcmask (!%p290_p3), 257024  }
   0xb   : > { %s1339_s17 = smov (!%p290_p3), 56   ;;  %s1340_s18 = smov (!%p290_p3), 48  }
   0xc   : > { %1176 = vmatpush3.bf16.msra.mxu0 (!%p290_p3), %v1278_v10  ;;  %s1341_s19 = smov (!%p290_p3), 40   ;;  %s1342_s20 = smov (!%p290_p3), 8  }
   0xd   : > { %1187 = vmatprep.subr.bf16.mxu0 (!%p290_p3), %v1329_v9 }
   0xe   : > { %s1550_s27 = smov (!%p331_p4, %s1319_s27), 1 }
   0xf   : > { %s1408_s9 = sshll.u32 %s1550_s27, 2  ;;  %s1335_s27 = smov 112  }
  0x10   : > { %s1414_s12 = scalar_lea.vmem %s1536_s0, %s1408_s9  ;;  %s341_s15 = scalar_lea.vmem %s1537_s1, %s1408_s9 }
  0x11   : > { %v354_v0 = vld [vmem:[%s1414_s12] sm:$0xf]  ;;  %s348_s14 = scalar_lea.vmem %s1544_s8, %s1408_s9 }
  0x12   : > { %v355_v1 = vunpack.c.l.bf16 %v354_v0  ;;  %v474_v52 = vld [vmem:[%s341_s15] sm:$0xf] }
  0x13   : > { %v475_v53 = vunpack.c.l.bf16 %v474_v52 }
  0x14   : > { %v357_v2 = vsel %vm356_vm0, %v355_v1, 0.0 }
  0x15   : > { %358 = vadd.xlane.f32.xlu0 %v357_v2 }
  0xa2   : > { %v359_v3 = vpop.xlane.xlu0 %358 }
  0xa3   : > { %v361_v4 = vmul.f32 0.03125, %v359_v3 }
  0xa5   : > { %v362_v5 = vsub.f32 %v355_v1, %v361_v4 }
  0xa7   : > { %v363_v6 = vmul.f32 %v362_v5, %v362_v5  ;;  %v376_v20 = vmul.f32 %v1127_v19, %v362_v5 }
  0xa9   : > { %v364_v7 = vsel %vm356_vm0, %v363_v6, 0.0 }
  0xaa   : > { %365 = vadd.xlane.f32.xlu0 %v364_v7 }
 0x137   : > { %v366_v11 = vpop.xlane.xlu0 %365 }
 0x138   : > { %v368_v12 = vmul.f32 0.032258064, %v366_v11 }
 0x13a   : > { %1285 = vrsqrt.f32 %v368_v12  ;;  %vm379_vm2 = vcmp.eq.f32.partialorder %v368_v12, inf  ;;  %v382_v15 = vand.u32 2147483648, %v368_v12  ;;  %vm381_vm3 = vcmp.eq.f32.partialorder %v368_v12, 0.0 }
 0x144   : > { %v1286_v13 = vpop.eup %1285 }
 0x145   : > { %v378_v14 = vmul.f32 %v1286_v13, %v368_v12 }
 0x147   : > { %v380_v16 = vsel %vm379_vm2, %v368_v12, %v378_v14 }
 0x148   : > { %v383_v17 = vsel %vm381_vm3, %v382_v15, %v380_v16 }
 0x149   : > { %v384_v18 = vadd.f32 1e-06, %v383_v17 }
 0x14b   : > { %1287 = vrcp.f32 %v384_v18 }
 0x155   : > { %v1288_v21 = vpop.eup %1287 }
 0x156   : > { %v386_v23 = vmul.f32 %v1288_v21, %v376_v20 }
 0x158   : > { %v394_v24 = vadd.f32 %v1128_v22, %v386_v23 }
 0x15a   : > { %v395_v25 = vpack.c.bf16 %v394_v24, %v394_v24 }
 0x15c   : > { %1178 = vmatmul.mubr.msk.bf16.vlgmr.msra.gmra.mrb[0].mxu0 %vm356_vm0, %v395_v25 }
 0x15d   : > { %1189 = vmatprep.mubr.msk.bf16.mxu0 %vm1330_vm1, %v1329_v9 }
 0x22f   : > { %v456_v27 = vpop.f32.mrb[0].mxu0 }
 0x230   : > { %v457_v28 = vadd.f32 %v1129_v26, %v456_v27  ;;  %v1179_v29 = vpop.f32.mrb[1].mxu0 }
 0x231   : > { %v459_v30 = vpop.f32.mrb[2].mxu0 }
 0x232   : > { %v462_v31 = vpack.c.bf16 %v457_v28, %v457_v28  ;;  %v1180_v32 = vpop.f32.mrb[3].mxu0 }
 0x234   : > { %464 = vst.msk [vmem:[#allocation2] sm:$0xf] %vm463_vm4, %v462_v31 }
 0x23b   : > { %v1445_v33 = vld [vmem:[#allocation2] ss:$0 sps:$4 sm:$0xff]  }
 0x23c   : > { %v470_v34 = vld [vmem:[#allocation2] sm:$0xf]  ;;  %480 = vrot.lane.b32.xlu1 %v1445_v33, %s1331_s23 }
 0x23d   : > { %v471_v35 = vunpack.c.l.bf16 %v470_v34  ;;  %v1448_v36 = vld [vmem:[#allocation2] ss:$0 sps:$4 sm:$0xff]  }
 0x23e   : > { %v1451_v39 = vld [vmem:[#allocation2] ss:$0 sps:$4 sm:$0xff]  }
 0x23f   : > { %v472_v37 = vmul.f32 0.35355338, %v471_v35  ;;  %v1454_v40 = vld [vmem:[#allocation2] ss:$0 sps:$4 sm:$0xff]  }
 0x240   : > { %598 = vrot.lane.b32.xlu1 %v1448_v36, %s1332_s24 }
 0x241   : > { %v473_v38 = vpack.c.bf16 %v472_v37, %v472_v37 }
 0x243   : > { %593 = vrot.lane.b32.xlu0 %v473_v38, %s1333_s25  ;;  %s1343_s25 = smov 16  }
 0x244   : > { %718 = vrot.lane.b32.xlu1 %v1451_v39, %s1334_s26  ;;  %s1344_s26 = smov 24  }
 0x248   : > { %713 = vrot.lane.b32.xlu1 %v473_v38, %s1335_s27 }
 0x24c   : > { %838 = vrot.lane.b32.xlu1 %v1454_v40, %s1336_s10 }
 0x250   : > { %833 = vrot.lane.b32.xlu1 %v473_v38, %s1337_s11 }
 0x2ae   : > { %v481_v41 = vpop.permute.xlu1 %480 }
 0x2af   : > { %v487_v42 = vsel %vm482_vm5, %v481_v41, 0 }
 0x2b0   : > { %1182 = vmatpush3.bf16.xpose.msra.mxu1 %v487_v42 }
 0x2b1   : > { %1193 = vmatprep.subr.bf16.mxu1 %v1329_v9 }
 0x2b2   : > { %v599_v43 = vpop.permute.xlu1 %598 }
 0x2b3   : > { %v604_v44 = vsel %vm482_vm5, %v599_v43, 0 }
 0x2b5   : > { %v594_v46 = vpop.permute.xlu0 %593 }
 0x2b6   : > { %v719_v45 = vpop.permute.xlu1 %718 }
 0x2b7   : > { %1184 = vmatmul.mubr.msk.bf16.vlgmr.msra.gmra.mrb[0].mxu1 %vm482_vm5, %v473_v38  ;;  %v724_v48 = vsel %vm482_vm5, %v719_v45, 0 }
 0x2b8   : > { %1194 = vmatpush3.bf16.xpose.msra.mxu1 %v604_v44  ;;  %1195 = vmatprep.mubr.msk.bf16.mxu1 %vm1330_vm1, %v1329_v9 }
 0x2b9   : > { %1205 = vmatprep.subr.bf16.mxu1 %v1329_v9 }
 0x2ba   : > { %v714_v47 = vpop.permute.xlu1 %713 }
 0x2be   : > { %v839_v49 = vpop.permute.xlu1 %838 }
 0x2bf   : > { %1196 = vmatmul.mubr.msk.bf16.vlgmr.msra.gmra.mrb[4].mxu1 %vm482_vm5, %v594_v46  ;;  %v844_v50 = vsel %vm482_vm5, %v839_v49, 0 }
 0x2c0   : > { %1206 = vmatpush3.bf16.xpose.msra.mxu1 %v724_v48  ;;  %1207 = vmatprep.mubr.msk.bf16.mxu1 %vm1330_vm1, %v1329_v9 }
 0x2c1   : > { %1217 = vmatprep.subr.bf16.mxu1 %v1329_v9 }
 0x2c2   : > { %v834_v51 = vpop.permute.xlu1 %833 }
 0x2c7   : > { %1208 = vmatmul.mubr.msk.bf16.vlgmr.msra.gmra.mrb[8].mxu1 %vm482_vm5, %v714_v47 }
 0x2c8   : > { %1218 = vmatpush3.bf16.xpose.msra.mxu1 %v844_v50  ;;  %1219 = vmatprep.mubr.msk.bf16.mxu1 %vm1330_vm1, %v1329_v9 }
 0x2c9   : > { %1229 = vmatprep.subr.bf16.mxu1 %v1329_v9 }
 0x2cf   : > { %1220 = vmatmul.mubr.msk.bf16.vlgmr.msra.gmra.mrb[12].mxu1 %vm482_vm5, %v834_v51 }
 0x2d0   : > { %1233 = vmatprep.mubr.msk.bf16.mxu1 %vm1330_vm1, %v1329_v9 }
 0x38a   : > { %v523_v54 = vpop.f32.mrb[0].mxu1 }
 0x38b   : > { %v524_v55 = vadd.f32 %v523_v54, %v475_v53  ;;  %v1185_v56 = vpop.f32.mrb[1].mxu1 }
 0x38c   : > { %v526_v57 = vpop.f32.mrb[2].mxu1 }
 0x38d   : > { %v1186_v58 = vpop.f32.mrb[3].mxu1  ;;  %v529_v59 = vsel %vm482_vm5, %v524_v55, -inf }
 0x38e   : > { %530 = vmax.xlane.f32.xlu1 %v529_v59 }
 0x392   : > { %v640_v60 = vpop.f32.mrb[4].mxu1 }
 0x393   : > { %v641_v61 = vadd.f32 %v640_v60, %v475_v53  ;;  %v1197_v62 = vpop.f32.mrb[5].mxu1 }
 0x394   : > { %v643_v63 = vpop.f32.mrb[6].mxu1 }
 0x395   : > { %v1198_v0 = vpop.f32.mrb[7].mxu1  ;;  %v646_v1 = vsel %vm482_vm5, %v641_v61, -inf }
 0x396   : > { %647 = vmax.xlane.f32.xlu0 %v646_v1 }
 0x39a   : > { %v760_v2 = vpop.f32.mrb[8].mxu1 }
 0x39b   : > { %v761_v3 = vadd.f32 %v760_v2, %v475_v53  ;;  %v1209_v4 = vpop.f32.mrb[9].mxu1 }
 0x39c   : > { %v763_v5 = vpop.f32.mrb[10].mxu1  ;;  %v1284_v4 = vld [vmem:[%s1542_s6 + $0x8] sm:$0xff]  }
 0x39d   : > { %v1210_v6 = vpop.f32.mrb[11].mxu1  ;;  %v766_v7 = vsel %vm482_vm5, %v761_v3, -inf }
 0x39e   : > { %767 = vmax.xlane.f32.xlu1 %v766_v7 }
 0x3a2   : > { %v880_v8 = vpop.f32.mrb[12].mxu1 }
 0x3a3   : > { %v881_v10 = vadd.f32 %v880_v8, %v475_v53  ;;  %v1221_v11 = vpop.f32.mrb[13].mxu1 }
 0x3a4   : > { %v883_v12 = vpop.f32.mrb[14].mxu1 }
 0x3a5   : > { %v1222_v13 = vpop.f32.mrb[15].mxu1  ;;  %v886_v14 = vsel %vm482_vm5, %v881_v10, -inf }
 0x3a6   : > { %887 = vmax.xlane.f32.xlu0 %v886_v14 }
 0x41b   : > { %v531_v15 = vpop.xlane.xlu1 %530 }
 0x41c   : > { %v532_v16 = vsub.f32 %v524_v55, %v531_v15 }
 0x41e   : > { %v533_v17 = vmul.f32 1.442695, %v532_v16 }
 0x420   : > { %1289 = vpow2.f32 %v533_v17 }
 0x423   : > { %v648_v18 = vpop.xlane.xlu0 %647 }
 0x424   : > { %v649_v19 = vsub.f32 %v641_v61, %v648_v18  ;;  %v1023_v18 = vld [vmem:[%s1414_s12] sm:$0xf] }
 0x426   : > { %v650_v20 = vmul.f32 1.442695, %v649_v19  ;;  %v1145_v19 = vld [vmem:[%s1543_s7] ss:$0 sm:$0xff] }
 0x428   : > { %1291 = vpow2.f32 %v650_v20  ;;  %v1024_v20 = vunpack.c.l.bf16 %v1023_v18 }
 0x42a   : > { %v1290_v21 = vpop.eup %1289 }
 0x42b   : > { %v535_v22 = vsel %vm482_vm5, %v1290_v21, 0.0  ;;  %v768_v30 = vpop.xlane.xlu1 %767 }
 0x42c   : > { %536 = vadd.xlane.f32.xlu1 %v535_v22  ;;  %v769_v31 = vsub.f32 %v761_v3, %v768_v30  ;;  %v1283_v3 = vld [vmem:[%s1542_s6] sm:$0xff]  }
 0x42d   : > { %1230 = vmatpush3.bf16.msra.mxu1 %v1283_v3 }
 0x42e   : > { %v770_v32 = vmul.f32 1.442695, %v769_v31  ;;  %1231 = vmatprep.subr.bf16.mxu1 %v1329_v9 }
 0x431   : > { %1232 = vmatpush3.bf16.msra.mxu1 %v1284_v4 }
 0x432   : > { %v1292_v23 = vpop.eup %1291 }
 0x433   : > { %v888_v24 = vpop.xlane.xlu0 %887  ;;  %v652_v25 = vsel %vm482_vm5, %v1292_v23, 0.0 }
 0x434   : > { %v889_v26 = vsub.f32 %v881_v10, %v888_v24  ;;  %653 = vadd.xlane.f32.xlu0 %v652_v25 }
 0x436   : > { %v890_v27 = vmul.f32 1.442695, %v889_v26 }
 0x438   : > { %1293 = vpow2.f32 %v890_v27 }
 0x439   : > { %1295 = vpow2.f32 %v770_v32 }
 0x43d   : > { %541 = vrot.lane.b32.xlu1 %v1445_v33, %s1338_s16 }
 0x442   : > { %v1294_v28 = vpop.eup %1293 }
 0x443   : > { %v892_v29 = vsel %vm482_vm5, %v1294_v28, 0.0  ;;  %v1296_v34 = vpop.eup %1295 }
 0x444   : > { %893 = vadd.xlane.f32.xlu0 %v892_v29  ;;  %v772_v35 = vsel %vm482_vm5, %v1296_v34, 0.0 }
 0x45a   : > { %658 = vrot.lane.b32.xlu0 %v1448_v36, %s1339_s17 }
 0x461   : > { %773 = vadd.xlane.f32.xlu1 %v772_v35 }
 0x472   : > { %778 = vrot.lane.b32.xlu1 %v1451_v39, %s1340_s18 }
 0x476   : > { %898 = vrot.lane.b32.xlu1 %v1454_v40, %s1341_s19 }
 0x4b9   : > { %v537_v33 = vpop.xlane.xlu1 %536 }
 0x4ba   : > { %1297 = vrcp.f32 %v537_v33 }
 0x4bd   : > { %v542_v37 = vpop.permute.xlu1 %541 }
 0x4be   : > { %v548_v38 = vsel %vm546_vm6, %v542_v37, 0 }
 0x4bf   : > { %1188 = vmatpush3.bf16.msra.mxu0 %v548_v38 }
 0x4c0   : > { %1199 = vmatprep.subr.bf16.mxu0 %v1329_v9 }
 0x4c1   : > { %v654_v41 = vpop.xlane.xlu0 %653 }
 0x4c2   : > { %1299 = vrcp.f32 %v654_v41 }
 0x4c4   : > { %v1298_v36 = vpop.eup %1297 }
 0x4c5   : > { %v539_v42 = vmul.f32 %v1298_v36, %v1290_v21 }
 0x4c7   : > { %v540_v43 = vpack.c.bf16 %v539_v42, %v539_v42 }
 0x4c9   : > { %1190 = vmatmul.mubr.msk.bf16.vlgmr.msra.gmra.mrb[4].mxu0 %vm482_vm5, %v540_v43 }
 0x4ca   : > { %1201 = vmatprep.mubr.msk.bf16.mxu0 %vm1330_vm1, %v1329_v9 }
 0x4cc   : > { %v1300_v39 = vpop.eup %1299 }
 0x4cd   : > { %v656_v44 = vmul.f32 %v1300_v39, %v1292_v23 }
 0x4cf   : > { %v657_v47 = vpack.c.bf16 %v656_v44, %v656_v44 }
 0x4d1   : > { %v894_v40 = vpop.xlane.xlu0 %893 }
 0x4d5   : > { %v659_v45 = vpop.permute.xlu0 %658 }
 0x4d6   : > { %v664_v46 = vsel %vm546_vm6, %v659_v45, 0 }
 0x4d7   : > { %1200 = vmatpush3.bf16.msra.mxu0 %v664_v46 }
 0x4d8   : > { %1211 = vmatprep.subr.bf16.mxu0 %v1329_v9 }
 0x4da   : > { %1202 = vmatmul.mubr.msk.bf16.vlgmr.msra.gmra.mrb[8].mxu0 %vm482_vm5, %v657_v47 }
 0x4db   : > { %1213 = vmatprep.mubr.msk.bf16.mxu0 %vm1330_vm1, %v1329_v9 }
 0x4ee   : > { %v774_v48 = vpop.xlane.xlu1 %773 }
 0x4ef   : > { %1301 = vrcp.f32 %v774_v48 }
 0x4f0   : > { %1303 = vrcp.f32 %v894_v40 }
 0x4f2   : > { %v779_v49 = vpop.permute.xlu1 %778 }
 0x4f3   : > { %v784_v50 = vsel %vm546_vm6, %v779_v49, 0 }
 0x4f4   : > { %1212 = vmatpush3.bf16.msra.mxu0 %v784_v50 }
 0x4f5   : > { %1223 = vmatprep.subr.bf16.mxu0 %v1329_v9 }
 0x4f6   : > { %v899_v53 = vpop.permute.xlu1 %898 }
 0x4f7   : > { %v904_v56 = vsel %vm546_vm6, %v899_v53, 0 }
 0x4f9   : > { %v1302_v51 = vpop.eup %1301 }
 0x4fa   : > { %v776_v52 = vmul.f32 %v1302_v51, %v1296_v34  ;;  %v1304_v55 = vpop.eup %1303 }
 0x4fb   : > { %v896_v57 = vmul.f32 %v1304_v55, %v1294_v28 }
 0x4fc   : > { %v777_v54 = vpack.c.bf16 %v776_v52, %v776_v52 }
 0x4fd   : > { %v897_v58 = vpack.c.bf16 %v896_v57, %v896_v57 }
 0x4fe   : > { %1214 = vmatmul.mubr.msk.bf16.vlgmr.msra.gmra.mrb[12].mxu0 %vm482_vm5, %v777_v54 }
 0x4ff   : > { %1224 = vmatpush3.bf16.msra.mxu0 %v904_v56  ;;  %1225 = vmatprep.mubr.msk.bf16.mxu0 %vm1330_vm1, %v1329_v9 }
 0x506   : > { %1226 = vmatmul.mubr.msk.bf16.vlgmr.msra.gmra.mrb[16].mxu0 %vm482_vm5, %v897_v58 }
 0x59c   : > { %v584_v59 = vpop.f32.mrb[4].mxu0 }
 0x59d   : > { %590 = vst.msk [vmem:[#allocation3] sm:$0xff] %vm482_vm5, %v584_v59  ;;  %v1191_v60 = vpop.f32.mrb[5].mxu0 }
 0x59e   : > { %v587_v61 = vpop.f32.mrb[6].mxu0 }
 0x59f   : > { %v1192_v62 = vpop.f32.mrb[7].mxu0 }
 0x5ad   : > { %v700_v63 = vpop.f32.mrb[8].mxu0 }
 0x5ae   : > { %707 = vrot.lane.b32.xlu0 %v700_v63, %s1342_s20  ;;  %v1203_v0 = vpop.f32.mrb[9].mxu0 }
 0x5af   : > { %v703_v1 = vpop.f32.mrb[10].mxu0 }
 0x5b0   : > { %v1204_v2 = vpop.f32.mrb[11].mxu0 }
 0x5d1   : > { %v820_v5 = vpop.f32.mrb[12].mxu0 }
 0x5d2   : > { %827 = vrot.lane.b32.xlu1 %v820_v5, %s1343_s25  ;;  %v1215_v6 = vpop.f32.mrb[13].mxu0 }
 0x5d3   : > { %v823_v7 = vpop.f32.mrb[14].mxu0 }
 0x5d4   : > { %v1216_v8 = vpop.f32.mrb[15].mxu0 }
 0x5d9   : > { %v940_v10 = vpop.f32.mrb[16].mxu0 }
 0x5da   : > { %947 = vrot.lane.b32.xlu0 %v940_v10, %s1344_s26  ;;  %v1227_v11 = vpop.f32.mrb[17].mxu0 }
 0x5db   : > { %v943_v12 = vpop.f32.mrb[18].mxu0 }
 0x5dc   : > { %v1228_v13 = vpop.f32.mrb[19].mxu0 }
 0x620   : > { %v708_v14 = vpop.permute.xlu0 %707 }
 0x621   : > { %711 = vst.msk [vmem:[#allocation3] sm:$0xff] %vm710_vm7, %v708_v14 }
 0x644   : > { %v828_v15 = vpop.permute.xlu1 %827 }
 0x645   : > { %831 = vst.msk [vmem:[#allocation3] sm:$0xff] %vm830_vm8, %v828_v15 }
 0x64c   : > { %v948_v9 = vpop.permute.xlu0 %947 }
 0x64d   : > { %951 = vst.msk [vmem:[#allocation3] sm:$0xff] %vm950_vm9, %v948_v9 }
 0x654   : > { %v952_v16 = vld [vmem:[#allocation3] sm:$0xff] }
 0x655   : > { %v953_v17 = vpack.c.bf16 %v952_v16, %v952_v16 }
 0x657   : > { %1234 = vmatmul.mubr.msk.bf16.vlgmr.msra.gmra.mrb[16].mxu1 %vm356_vm0, %v953_v17 }
 0x72a   : > { %v1015_v21 = vpop.f32.mrb[16].mxu1 }
 0x72b   : > { %v1016_v22 = vadd.f32 %v1145_v19, %v1015_v21  ;;  %v1235_v23 = vpop.f32.mrb[17].mxu1 }
 0x72c   : > { %v1018_v24 = vpop.f32.mrb[18].mxu1 }
 0x72d   : > { %v1025_v25 = vadd.f32 %v1024_v20, %v1016_v22  ;;  %v1236_v26 = vpop.f32.mrb[19].mxu1 }
 0x72f   : > { %v1026_v27 = vpack.c.bf16 %v1025_v25, %v1025_v25 }
 0x731   : > { %1028 = vst.msk [vmem:[%s348_s14] sm:$0xf] %vm1027_vm10, %v1026_v27 }
 0x732 PF: > { %s18_s29 = sadd.s32 1, %s1327_s29   ;;  %s1545_s27 = smov %s1323_s28 }
 0x733   : > { %p15_p5 = scmp.ge.s32.totalorder %s18_s29, 4   ;;  %s1546_s28 = smov %s1548_s30 }
 0x735   :  { %17 = sbr.rel (!%p15_p5) target bundleno = 2 (0x2), region = 91 }

</bundles_post_ra>
